<compile_context>
chip_gen: v7x
topology: tpu7x:2x2x1
jax: 0.10.0
libtpu: 0.0.40
codegen_flags: <defaults>
</compile_context>

<pallas_src>
import functools
import math

import jax
import jax.numpy as jnp
from jax import lax
from jax.experimental import pallas as pl
from jax.experimental.pallas import tpu as pltpu

C_PAD = 128  # lane-dense class dimension (one full vreg lane width)


# ---------------- fused Pallas kernel ----------------

def _gprgnn_kernel(x_ref, w1_ref, b1_ref, w2_ref, b2_ref, st_ref, dinv_ref,
                   dsqrt_ref, a_ref, temp_ref, out_ref, *, K, C):
    # --- FeedForwardNet (n_layers=2, eval): Linear -> PReLU -> Linear (C padded to 128) ---
    h = jnp.dot(x_ref[...], w1_ref[...], preferred_element_type=jnp.float32) + b1_ref[...]
    slope = a_ref[0]                                    # single-parameter PReLU
    h = jnp.where(h >= 0.0, h, slope * h)
    z = jnp.dot(h, w2_ref[...], preferred_element_type=jnp.float32) + b2_ref[...]

    # --- GPR_prop with the gcn_norm folded in: P = D^{-1/2} S^T D^{-1/2}.
    # Carry y_k = D^{-1/2} x_k so that
    #   y_{k+1} = dinv^2 * (S^T @ y_k)                (one VPU scale per step)
    #   hidden  = sqrt(deg) * sum_k temp[k] * y_k     (single rescale at the end)
    st = st_ref[...]                                   # bf16 0/1 adjacency, NOT promoted to f32
    dinv = dinv_ref[...]                               # (N, 1) f32, lane-broadcast below
    dinv2 = dinv * dinv

    yk = dinv * z
    acc = temp_ref[0] * yk
    for k in range(K):                                 # static full unroll, vreg carries
        # hi/lo bf16 split of the small (N,128) operand: two 1-pass bf16 MXU matmuls give
        # ~f32 accuracy while keeping the N^2 operand in bf16 (no f32 MXU decomposition).
        y_hi = yk.astype(jnp.bfloat16)
        y_lo = (yk - y_hi.astype(jnp.float32)).astype(jnp.bfloat16)
        sy = (jnp.dot(st, y_hi, preferred_element_type=jnp.float32)
              + jnp.dot(st, y_lo, preferred_element_type=jnp.float32))
        yk = dinv2 * sy
        acc = acc + temp_ref[k + 1] * yk
    hid = dsqrt_ref[...] * acc                         # back to x-space

    # --- row-wise log_softmax over the real C classes; padded lanes are excluded ---
    lane = lax.broadcasted_iota(jnp.int32, hid.shape, 1)
    valid = lane < C
    neg = jnp.finfo(jnp.float32).min
    m = jnp.max(jnp.where(valid, hid, neg), axis=1, keepdims=True)
    e = jnp.where(valid, jnp.exp(hid - m), 0.0)        # exp/log go to the EUP slot
    lse = jnp.log(jnp.sum(e, axis=1, keepdims=True)) + m
    out_ref[...] = hid - lse                           # padded lanes hold junk; sliced outside


# ---------------- wrapper ----------------

def _vmem_limit_bytes():
    # Raise the scoped-VMEM limit (defaults 16 MiB v5e / 32 MiB v6e,v7x) so the adjacency
    # stays resident across all K steps; keep headroom below physical (128/128/64 MiB).
    try:
        cap = int(pltpu.get_tpu_info().vmem_capacity_bytes)
    except Exception:
        return 48 << 20                                # safe on every generation
    return min(cap * 3 // 4, 100 << 20)


def gprgnn_forward(x, st, dinv, dsqrt, w1, b1, w2, b2, prelu_a, temp, *, K):
    """Single fused pallas_call: MLP -> GPR propagation (K unrolled) -> log_softmax."""
    N = x.shape[0]
    C = w2.shape[1]

    # Lane-dense class dimension: zero-pad the last linear layer to 128 output columns so
    # all propagation vregs and the output store use every lane (no masked partial stores).
    w2p = jnp.zeros((w2.shape[0], C_PAD), w2.dtype).at[:, :C].set(w2)
    b2p = jnp.zeros((1, C_PAD), b2.dtype).at[:, :C].set(b2)

    vmem = pl.BlockSpec(memory_space=pltpu.MemorySpace.VMEM)
    smem = pl.BlockSpec(memory_space=pltpu.MemorySpace.SMEM)
    out_pad = pl.pallas_call(
        functools.partial(_gprgnn_kernel, K=K, C=C),
        out_shape=jax.ShapeDtypeStruct((N, C_PAD), jnp.float32),
        in_specs=[vmem, vmem, vmem, vmem, vmem, vmem, vmem, vmem, smem, smem],
        out_specs=vmem,
        compiler_params=pltpu.CompilerParams(vmem_limit_bytes=_vmem_limit_bytes()),
    )(x, w1, b1, w2p, b2p, st, dinv, dsqrt, prelu_a, temp)
    return out_pad[:, :C]


# ---------------- glue (plain JAX, no N^2 P materialization) ----------------

def build_norm_adjacency(A, *, adj_dtype=jnp.bfloat16):
    """Dense equivalent of gcn_norm on edge_index = where(A):
       binary edges, add remaining self loops, symmetric normalization with degree over the
       TARGET index (PyG aggregates at targets, so the operator is D^{-1/2} S^T D^{-1/2}).
       Returns (S^T, dinv, sqrt(deg)) so all scaling folds into the kernel; the scaled P is
       never written to HBM.  S^T entries are 0/1 so bf16 storage is exact."""
    N = A.shape[0]
    S = jnp.where(A != 0, 1.0, 0.0).astype(jnp.float32)
    S = jnp.maximum(S, jnp.eye(N, dtype=jnp.float32))      # add_remaining_self_loops
    deg = jnp.sum(S, axis=0)                               # degree over target index
    dinv = jnp.where(deg > 0, lax.rsqrt(deg), 0.0)
    dsqrt = jnp.where(deg > 0, jnp.sqrt(deg), 0.0)
    return (S.T.astype(adj_dtype),
            dinv.reshape(N, 1).astype(jnp.float32),
            dsqrt.reshape(N, 1).astype(jnp.float32))


# ---------------- main ----------------

if __name__ == "__main__":
    N, F, C, K, alpha = 64, 32, 8, 10, 0.1   # nodes, num_feat, classes, prop steps

    key = jax.random.PRNGKey(0)
    k_a, k_x, k_w1, k_w2, k_t = jax.random.split(key, 5)

    # Synthetic adjacency + node features
    A = (jax.random.uniform(k_a, (N, N)) < 0.1).astype(jnp.float32)
    x = jax.random.normal(k_x, (N, F), dtype=jnp.float32)

    # FeedForwardNet params: xavier_uniform with gain('relu'), zero bias, PReLU slope 0.25
    gain = math.sqrt(2.0)

    def xavier(k, fan_in, fan_out):
        bound = gain * math.sqrt(6.0 / (fan_in + fan_out))
        return jax.random.uniform(k, (fan_in, fan_out), jnp.float32, -bound, bound)

    w1 = xavier(k_w1, F, F)
    b1 = jnp.zeros((1, F), jnp.float32)
    w2 = xavier(k_w2, F, C)
    b2 = jnp.zeros((1, C), jnp.float32)
    prelu_a = jnp.array([0.25], dtype=jnp.float32)

    # GPR_prop temp coefficients, Init='Random'
    bound = math.sqrt(3.0 / (K + 1))
    temp = jax.random.uniform(k_t, (K + 1,), jnp.float32, -bound, bound)
    temp = temp / jnp.sum(jnp.abs(temp))

    st, dinv, dsqrt = build_norm_adjacency(A)
    out = gprgnn_forward(x, st, dinv, dsqrt, w1, b1, w2, b2, prelu_a, temp, K=K)
    out = jax.block_until_ready(out)

    # Pure-JAX reference (explicit P matrix, all f32)
    h_ref = x @ w1 + b1
    h_ref = jnp.where(h_ref >= 0.0, h_ref, 0.25 * h_ref)
    z_ref = h_ref @ w2 + b2
    S = jnp.maximum(jnp.where(A != 0, 1.0, 0.0), jnp.eye(N))
    deg = jnp.sum(S, axis=0)
    dinv_ref = jnp.where(deg > 0, lax.rsqrt(deg), 0.0)
    P_ref = dinv_ref[:, None] * S.T * dinv_ref[None, :]
    hid = temp[0] * z_ref
    xcur = z_ref
    for k in range(K):
        xcur = P_ref @ xcur
        hid = hid + temp[k + 1] * xcur
    ref = jax.nn.log_softmax(hid, axis=1)

    assert out.shape == (N, C)
    assert jnp.allclose(out, ref, atol=1e-3), "mismatch vs reference"

    print("KERNEL_OK")
</pallas_src>

<mosaic_0001>
module attributes {stable_mosaic.version = 11 : i64} {
  func.func @_gprgnn_kernel(%arg0: memref<64x32xf32, #tpu.memory_space<vmem>>, %arg1: memref<32x32xf32, #tpu.memory_space<vmem>>, %arg2: memref<1x32xf32, #tpu.memory_space<vmem>>, %arg3: memref<32x128xf32, #tpu.memory_space<vmem>>, %arg4: memref<1x128xf32, #tpu.memory_space<vmem>>, %arg5: memref<64x64xbf16, #tpu.memory_space<vmem>>, %arg6: memref<64x1xf32, #tpu.memory_space<vmem>>, %arg7: memref<64x1xf32, #tpu.memory_space<vmem>>, %arg8: memref<1xf32, #tpu.memory_space<smem>>, %arg9: memref<11xf32, #tpu.memory_space<smem>>, %arg10: memref<64x128xf32, #tpu.memory_space<vmem>>) attributes {dimension_semantics = [], scalar_prefetch = 0 : i64, scratch_operands = 0 : i64, tpu.core_type = #tpu.core_type<tc>} {
    %c0 = arith.constant 0 : index
    %c0_0 = arith.constant 0 : index
    %0 = vector.load %arg0[%c0, %c0_0] : memref<64x32xf32, #tpu.memory_space<vmem>>, vector<64x32xf32>
    %c0_1 = arith.constant 0 : index
    %c0_2 = arith.constant 0 : index
    %1 = vector.load %arg1[%c0_1, %c0_2] : memref<32x32xf32, #tpu.memory_space<vmem>>, vector<32x32xf32>
    %cst = arith.constant dense<0.000000e+00> : vector<64x32xf32>
    %2 = tpu.matmul %0, %1, %cst {dimension_numbers = #tpu.dot_dimension_numbers<[1], [0], [0], [1], [0, 0, 1, 1], [], []>} : vector<64x32xf32>, vector<32x32xf32>, vector<64x32xf32> -> vector<64x32xf32>
    %c0_3 = arith.constant 0 : index
    %c0_4 = arith.constant 0 : index
    %3 = vector.load %arg2[%c0_3, %c0_4] : memref<1x32xf32, #tpu.memory_space<vmem>>, vector<1x32xf32>
    %4 = vector.broadcast %3 : vector<1x32xf32> to vector<64x32xf32>
    %5 = arith.addf %2, %4 : vector<64x32xf32>
    %c0_5 = arith.constant 0 : index
    %6 = memref.load %arg8[%c0_5] : memref<1xf32, #tpu.memory_space<smem>>
    %cst_6 = arith.constant 0.000000e+00 : f32
    %7 = vector.broadcast %cst_6 : f32 to vector<64x32xf32>
    %8 = arith.cmpf oge, %5, %7 : vector<64x32xf32>
    %9 = vector.broadcast %6 : f32 to vector<64x32xf32>
    %10 = arith.mulf %9, %5 : vector<64x32xf32>
    %11 = arith.select %8, %5, %10 : vector<64x32xi1>, vector<64x32xf32>
    %c0_7 = arith.constant 0 : index
    %c0_8 = arith.constant 0 : index
    %12 = vector.load %arg3[%c0_7, %c0_8] : memref<32x128xf32, #tpu.memory_space<vmem>>, vector<32x128xf32>
    %cst_9 = arith.constant dense<0.000000e+00> : vector<64x128xf32>
    %13 = tpu.matmul %11, %12, %cst_9 {dimension_numbers = #tpu.dot_dimension_numbers<[1], [0], [0], [1], [0, 0, 1, 1], [], []>} : vector<64x32xf32>, vector<32x128xf32>, vector<64x128xf32> -> vector<64x128xf32>
    %c0_10 = arith.constant 0 : index
    %c0_11 = arith.constant 0 : index
    %14 = vector.load %arg4[%c0_10, %c0_11] : memref<1x128xf32, #tpu.memory_space<vmem>>, vector<1x128xf32>
    %15 = vector.broadcast %14 : vector<1x128xf32> to vector<64x128xf32>
    %16 = arith.addf %13, %15 : vector<64x128xf32>
    %c0_12 = arith.constant 0 : index
    %c0_13 = arith.constant 0 : index
    %17 = vector.load %arg5[%c0_12, %c0_13] : memref<64x64xbf16, #tpu.memory_space<vmem>>, vector<64x64xbf16>
    %c0_14 = arith.constant 0 : index
    %c0_15 = arith.constant 0 : index
    %18 = vector.load %arg6[%c0_14, %c0_15] : memref<64x1xf32, #tpu.memory_space<vmem>>, vector<64x1xf32>
    %19 = arith.mulf %18, %18 : vector<64x1xf32>
    %20 = vector.broadcast %18 : vector<64x1xf32> to vector<64x128xf32>
    %21 = arith.mulf %20, %16 : vector<64x128xf32>
    %c0_16 = arith.constant 0 : index
    %22 = memref.load %arg9[%c0_16] : memref<11xf32, #tpu.memory_space<smem>>
    %23 = vector.broadcast %22 : f32 to vector<64x128xf32>
    %24 = arith.mulf %23, %21 : vector<64x128xf32>
    %25 = arith.truncf %21 : vector<64x128xf32> to vector<64x128xbf16>
    %26 = arith.extf %25 : vector<64x128xbf16> to vector<64x128xf32>
    %27 = arith.subf %21, %26 : vector<64x128xf32>
    %28 = arith.truncf %27 : vector<64x128xf32> to vector<64x128xbf16>
    %cst_17 = arith.constant dense<0.000000e+00> : vector<64x128xf32>
    %29 = tpu.matmul %17, %25, %cst_17 {dimension_numbers = #tpu.dot_dimension_numbers<[1], [0], [0], [1], [0, 0, 1, 1], [], []>} : vector<64x64xbf16>, vector<64x128xbf16>, vector<64x128xf32> -> vector<64x128xf32>
    %cst_18 = arith.constant dense<0.000000e+00> : vector<64x128xf32>
    %30 = tpu.matmul %17, %28, %cst_18 {dimension_numbers = #tpu.dot_dimension_numbers<[1], [0], [0], [1], [0, 0, 1, 1], [], []>} : vector<64x64xbf16>, vector<64x128xbf16>, vector<64x128xf32> -> vector<64x128xf32>
    %31 = arith.addf %29, %30 : vector<64x128xf32>
    %32 = vector.broadcast %19 : vector<64x1xf32> to vector<64x128xf32>
    %33 = arith.mulf %32, %31 : vector<64x128xf32>
    %c1 = arith.constant 1 : index
    %34 = memref.load %arg9[%c1] : memref<11xf32, #tpu.memory_space<smem>>
    %35 = vector.broadcast %34 : f32 to vector<64x128xf32>
    %36 = arith.mulf %35, %33 : vector<64x128xf32>
    %37 = arith.addf %24, %36 : vector<64x128xf32>
    %38 = arith.truncf %33 : vector<64x128xf32> to vector<64x128xbf16>
    %39 = arith.extf %38 : vector<64x128xbf16> to vector<64x128xf32>
    %40 = arith.subf %33, %39 : vector<64x128xf32>
    %41 = arith.truncf %40 : vector<64x128xf32> to vector<64x128xbf16>
    %cst_19 = arith.constant dense<0.000000e+00> : vector<64x128xf32>
    %42 = tpu.matmul %17, %38, %cst_19 {dimension_numbers = #tpu.dot_dimension_numbers<[1], [0], [0], [1], [0, 0, 1, 1], [], []>} : vector<64x64xbf16>, vector<64x128xbf16>, vector<64x128xf32> -> vector<64x128xf32>
    %cst_20 = arith.constant dense<0.000000e+00> : vector<64x128xf32>
    %43 = tpu.matmul %17, %41, %cst_20 {dimension_numbers = #tpu.dot_dimension_numbers<[1], [0], [0], [1], [0, 0, 1, 1], [], []>} : vector<64x64xbf16>, vector<64x128xbf16>, vector<64x128xf32> -> vector<64x128xf32>
    %44 = arith.addf %42, %43 : vector<64x128xf32>
    %45 = vector.broadcast %19 : vector<64x1xf32> to vector<64x128xf32>
    %46 = arith.mulf %45, %44 : vector<64x128xf32>
    %c2 = arith.constant 2 : index
    %47 = memref.load %arg9[%c2] : memref<11xf32, #tpu.memory_space<smem>>
    %48 = vector.broadcast %47 : f32 to vector<64x128xf32>
    %49 = arith.mulf %48, %46 : vector<64x128xf32>
    %50 = arith.addf %37, %49 : vector<64x128xf32>
    %51 = arith.truncf %46 : vector<64x128xf32> to vector<64x128xbf16>
    %52 = arith.extf %51 : vector<64x128xbf16> to vector<64x128xf32>
    %53 = arith.subf %46, %52 : vector<64x128xf32>
    %54 = arith.truncf %53 : vector<64x128xf32> to vector<64x128xbf16>
    %cst_21 = arith.constant dense<0.000000e+00> : vector<64x128xf32>
    %55 = tpu.matmul %17, %51, %cst_21 {dimension_numbers = #tpu.dot_dimension_numbers<[1], [0], [0], [1], [0, 0, 1, 1], [], []>} : vector<64x64xbf16>, vector<64x128xbf16>, vector<64x128xf32> -> vector<64x128xf32>
    %cst_22 = arith.constant dense<0.000000e+00> : vector<64x128xf32>
    %56 = tpu.matmul %17, %54, %cst_22 {dimension_numbers = #tpu.dot_dimension_numbers<[1], [0], [0], [1], [0, 0, 1, 1], [], []>} : vector<64x64xbf16>, vector<64x128xbf16>, vector<64x128xf32> -> vector<64x128xf32>
    %57 = arith.addf %55, %56 : vector<64x128xf32>
    %58 = vector.broadcast %19 : vector<64x1xf32> to vector<64x128xf32>
    %59 = arith.mulf %58, %57 : vector<64x128xf32>
    %c3 = arith.constant 3 : index
    %60 = memref.load %arg9[%c3] : memref<11xf32, #tpu.memory_space<smem>>
    %61 = vector.broadcast %60 : f32 to vector<64x128xf32>
    %62 = arith.mulf %61, %59 : vector<64x128xf32>
    %63 = arith.addf %50, %62 : vector<64x128xf32>
    %64 = arith.truncf %59 : vector<64x128xf32> to vector<64x128xbf16>
    %65 = arith.extf %64 : vector<64x128xbf16> to vector<64x128xf32>
    %66 = arith.subf %59, %65 : vector<64x128xf32>
    %67 = arith.truncf %66 : vector<64x128xf32> to vector<64x128xbf16>
    %cst_23 = arith.constant dense<0.000000e+00> : vector<64x128xf32>
    %68 = tpu.matmul %17, %64, %cst_23 {dimension_numbers = #tpu.dot_dimension_numbers<[1], [0], [0], [1], [0, 0, 1, 1], [], []>} : vector<64x64xbf16>, vector<64x128xbf16>, vector<64x128xf32> -> vector<64x128xf32>
    %cst_24 = arith.constant dense<0.000000e+00> : vector<64x128xf32>
    %69 = tpu.matmul %17, %67, %cst_24 {dimension_numbers = #tpu.dot_dimension_numbers<[1], [0], [0], [1], [0, 0, 1, 1], [], []>} : vector<64x64xbf16>, vector<64x128xbf16>, vector<64x128xf32> -> vector<64x128xf32>
    %70 = arith.addf %68, %69 : vector<64x128xf32>
    %71 = vector.broadcast %19 : vector<64x1xf32> to vector<64x128xf32>
    %72 = arith.mulf %71, %70 : vector<64x128xf32>
    %c4 = arith.constant 4 : index
    %73 = memref.load %arg9[%c4] : memref<11xf32, #tpu.memory_space<smem>>
    %74 = vector.broadcast %73 : f32 to vector<64x128xf32>
    %75 = arith.mulf %74, %72 : vector<64x128xf32>
    %76 = arith.addf %63, %75 : vector<64x128xf32>
    %77 = arith.truncf %72 : vector<64x128xf32> to vector<64x128xbf16>
    %78 = arith.extf %77 : vector<64x128xbf16> to vector<64x128xf32>
    %79 = arith.subf %72, %78 : vector<64x128xf32>
    %80 = arith.truncf %79 : vector<64x128xf32> to vector<64x128xbf16>
    %cst_25 = arith.constant dense<0.000000e+00> : vector<64x128xf32>
    %81 = tpu.matmul %17, %77, %cst_25 {dimension_numbers = #tpu.dot_dimension_numbers<[1], [0], [0], [1], [0, 0, 1, 1], [], []>} : vector<64x64xbf16>, vector<64x128xbf16>, vector<64x128xf32> -> vector<64x128xf32>
    %cst_26 = arith.constant dense<0.000000e+00> : vector<64x128xf32>
    %82 = tpu.matmul %17, %80, %cst_26 {dimension_numbers = #tpu.dot_dimension_numbers<[1], [0], [0], [1], [0, 0, 1, 1], [], []>} : vector<64x64xbf16>, vector<64x128xbf16>, vector<64x128xf32> -> vector<64x128xf32>
    %83 = arith.addf %81, %82 : vector<64x128xf32>
    %84 = vector.broadcast %19 : vector<64x1xf32> to vector<64x128xf32>
    %85 = arith.mulf %84, %83 : vector<64x128xf32>
    %c5 = arith.constant 5 : index
    %86 = memref.load %arg9[%c5] : memref<11xf32, #tpu.memory_space<smem>>
    %87 = vector.broadcast %86 : f32 to vector<64x128xf32>
    %88 = arith.mulf %87, %85 : vector<64x128xf32>
    %89 = arith.addf %76, %88 : vector<64x128xf32>
    %90 = arith.truncf %85 : vector<64x128xf32> to vector<64x128xbf16>
    %91 = arith.extf %90 : vector<64x128xbf16> to vector<64x128xf32>
    %92 = arith.subf %85, %91 : vector<64x128xf32>
    %93 = arith.truncf %92 : vector<64x128xf32> to vector<64x128xbf16>
    %cst_27 = arith.constant dense<0.000000e+00> : vector<64x128xf32>
    %94 = tpu.matmul %17, %90, %cst_27 {dimension_numbers = #tpu.dot_dimension_numbers<[1], [0], [0], [1], [0, 0, 1, 1], [], []>} : vector<64x64xbf16>, vector<64x128xbf16>, vector<64x128xf32> -> vector<64x128xf32>
    %cst_28 = arith.constant dense<0.000000e+00> : vector<64x128xf32>
    %95 = tpu.matmul %17, %93, %cst_28 {dimension_numbers = #tpu.dot_dimension_numbers<[1], [0], [0], [1], [0, 0, 1, 1], [], []>} : vector<64x64xbf16>, vector<64x128xbf16>, vector<64x128xf32> -> vector<64x128xf32>
    %96 = arith.addf %94, %95 : vector<64x128xf32>
    %97 = vector.broadcast %19 : vector<64x1xf32> to vector<64x128xf32>
    %98 = arith.mulf %97, %96 : vector<64x128xf32>
    %c6 = arith.constant 6 : index
    %99 = memref.load %arg9[%c6] : memref<11xf32, #tpu.memory_space<smem>>
    %100 = vector.broadcast %99 : f32 to vector<64x128xf32>
    %101 = arith.mulf %100, %98 : vector<64x128xf32>
    %102 = arith.addf %89, %101 : vector<64x128xf32>
    %103 = arith.truncf %98 : vector<64x128xf32> to vector<64x128xbf16>
    %104 = arith.extf %103 : vector<64x128xbf16> to vector<64x128xf32>
    %105 = arith.subf %98, %104 : vector<64x128xf32>
    %106 = arith.truncf %105 : vector<64x128xf32> to vector<64x128xbf16>
    %cst_29 = arith.constant dense<0.000000e+00> : vector<64x128xf32>
    %107 = tpu.matmul %17, %103, %cst_29 {dimension_numbers = #tpu.dot_dimension_numbers<[1], [0], [0], [1], [0, 0, 1, 1], [], []>} : vector<64x64xbf16>, vector<64x128xbf16>, vector<64x128xf32> -> vector<64x128xf32>
    %cst_30 = arith.constant dense<0.000000e+00> : vector<64x128xf32>
    %108 = tpu.matmul %17, %106, %cst_30 {dimension_numbers = #tpu.dot_dimension_numbers<[1], [0], [0], [1], [0, 0, 1, 1], [], []>} : vector<64x64xbf16>, vector<64x128xbf16>, vector<64x128xf32> -> vector<64x128xf32>
    %109 = arith.addf %107, %108 : vector<64x128xf32>
    %110 = vector.broadcast %19 : vector<64x1xf32> to vector<64x128xf32>
    %111 = arith.mulf %110, %109 : vector<64x128xf32>
    %c7 = arith.constant 7 : index
    %112 = memref.load %arg9[%c7] : memref<11xf32, #tpu.memory_space<smem>>
    %113 = vector.broadcast %112 : f32 to vector<64x128xf32>
    %114 = arith.mulf %113, %111 : vector<64x128xf32>
    %115 = arith.addf %102, %114 : vector<64x128xf32>
    %116 = arith.truncf %111 : vector<64x128xf32> to vector<64x128xbf16>
    %117 = arith.extf %116 : vector<64x128xbf16> to vector<64x128xf32>
    %118 = arith.subf %111, %117 : vector<64x128xf32>
    %119 = arith.truncf %118 : vector<64x128xf32> to vector<64x128xbf16>
    %cst_31 = arith.constant dense<0.000000e+00> : vector<64x128xf32>
    %120 = tpu.matmul %17, %116, %cst_31 {dimension_numbers = #tpu.dot_dimension_numbers<[1], [0], [0], [1], [0, 0, 1, 1], [], []>} : vector<64x64xbf16>, vector<64x128xbf16>, vector<64x128xf32> -> vector<64x128xf32>
    %cst_32 = arith.constant dense<0.000000e+00> : vector<64x128xf32>
    %121 = tpu.matmul %17, %119, %cst_32 {dimension_numbers = #tpu.dot_dimension_numbers<[1], [0], [0], [1], [0, 0, 1, 1], [], []>} : vector<64x64xbf16>, vector<64x128xbf16>, vector<64x128xf32> -> vector<64x128xf32>
    %122 = arith.addf %120, %121 : vector<64x128xf32>
    %123 = vector.broadcast %19 : vector<64x1xf32> to vector<64x128xf32>
    %124 = arith.mulf %123, %122 : vector<64x128xf32>
    %c8 = arith.constant 8 : index
    %125 = memref.load %arg9[%c8] : memref<11xf32, #tpu.memory_space<smem>>
    %126 = vector.broadcast %125 : f32 to vector<64x128xf32>
    %127 = arith.mulf %126, %124 : vector<64x128xf32>
    %128 = arith.addf %115, %127 : vector<64x128xf32>
    %129 = arith.truncf %124 : vector<64x128xf32> to vector<64x128xbf16>
    %130 = arith.extf %129 : vector<64x128xbf16> to vector<64x128xf32>
    %131 = arith.subf %124, %130 : vector<64x128xf32>
    %132 = arith.truncf %131 : vector<64x128xf32> to vector<64x128xbf16>
    %cst_33 = arith.constant dense<0.000000e+00> : vector<64x128xf32>
    %133 = tpu.matmul %17, %129, %cst_33 {dimension_numbers = #tpu.dot_dimension_numbers<[1], [0], [0], [1], [0, 0, 1, 1], [], []>} : vector<64x64xbf16>, vector<64x128xbf16>, vector<64x128xf32> -> vector<64x128xf32>
    %cst_34 = arith.constant dense<0.000000e+00> : vector<64x128xf32>
    %134 = tpu.matmul %17, %132, %cst_34 {dimension_numbers = #tpu.dot_dimension_numbers<[1], [0], [0], [1], [0, 0, 1, 1], [], []>} : vector<64x64xbf16>, vector<64x128xbf16>, vector<64x128xf32> -> vector<64x128xf32>
    %135 = arith.addf %133, %134 : vector<64x128xf32>
    %136 = vector.broadcast %19 : vector<64x1xf32> to vector<64x128xf32>
    %137 = arith.mulf %136, %135 : vector<64x128xf32>
    %c9 = arith.constant 9 : index
    %138 = memref.load %arg9[%c9] : memref<11xf32, #tpu.memory_space<smem>>
    %139 = vector.broadcast %138 : f32 to vector<64x128xf32>
    %140 = arith.mulf %139, %137 : vector<64x128xf32>
    %141 = arith.addf %128, %140 : vector<64x128xf32>
    %142 = arith.truncf %137 : vector<64x128xf32> to vector<64x128xbf16>
    %143 = arith.extf %142 : vector<64x128xbf16> to vector<64x128xf32>
    %144 = arith.subf %137, %143 : vector<64x128xf32>
    %145 = arith.truncf %144 : vector<64x128xf32> to vector<64x128xbf16>
    %cst_35 = arith.constant dense<0.000000e+00> : vector<64x128xf32>
    %146 = tpu.matmul %17, %142, %cst_35 {dimension_numbers = #tpu.dot_dimension_numbers<[1], [0], [0], [1], [0, 0, 1, 1], [], []>} : vector<64x64xbf16>, vector<64x128xbf16>, vector<64x128xf32> -> vector<64x128xf32>
    %cst_36 = arith.constant dense<0.000000e+00> : vector<64x128xf32>
    %147 = tpu.matmul %17, %145, %cst_36 {dimension_numbers = #tpu.dot_dimension_numbers<[1], [0], [0], [1], [0, 0, 1, 1], [], []>} : vector<64x64xbf16>, vector<64x128xbf16>, vector<64x128xf32> -> vector<64x128xf32>
    %148 = arith.addf %146, %147 : vector<64x128xf32>
    %149 = vector.broadcast %19 : vector<64x1xf32> to vector<64x128xf32>
    %150 = arith.mulf %149, %148 : vector<64x128xf32>
    %c10 = arith.constant 10 : index
    %151 = memref.load %arg9[%c10] : memref<11xf32, #tpu.memory_space<smem>>
    %152 = vector.broadcast %151 : f32 to vector<64x128xf32>
    %153 = arith.mulf %152, %150 : vector<64x128xf32>
    %154 = arith.addf %141, %153 : vector<64x128xf32>
    %c0_37 = arith.constant 0 : index
    %c0_38 = arith.constant 0 : index
    %155 = vector.load %arg7[%c0_37, %c0_38] : memref<64x1xf32, #tpu.memory_space<vmem>>, vector<64x1xf32>
    %156 = vector.broadcast %155 : vector<64x1xf32> to vector<64x128xf32>
    %157 = arith.mulf %156, %154 : vector<64x128xf32>
    %158 = tpu.iota {dimensions = array<i32: 1>} : vector<64x128xi32>
    %c8_i32 = arith.constant 8 : i32
    %159 = vector.broadcast %c8_i32 : i32 to vector<64x128xi32>
    %160 = arith.cmpi slt, %158, %159 : vector<64x128xi32>
    %cst_39 = arith.constant -3.40282347E+38 : f32
    %161 = vector.broadcast %cst_39 : f32 to vector<64x128xf32>
    %162 = arith.select %160, %157, %161 : vector<64x128xi1>, vector<64x128xf32>
    %cst_40 = arith.constant dense<0xFF800000> : vector<64xf32>
    %163 = vector.multi_reduction <maximumf>, %162, %cst_40 [1] : vector<64x128xf32> to vector<64xf32>
    %164 = vector.shape_cast %163 : vector<64xf32> to vector<64x1xf32>
    %165 = vector.broadcast %164 : vector<64x1xf32> to vector<64x128xf32>
    %166 = arith.subf %157, %165 : vector<64x128xf32>
    %167 = math.exp %166 : vector<64x128xf32>
    %cst_41 = arith.constant 0.000000e+00 : f32
    %168 = vector.broadcast %cst_41 : f32 to vector<64x128xf32>
    %169 = arith.select %160, %167, %168 : vector<64x128xi1>, vector<64x128xf32>
    %cst_42 = arith.constant dense<0.000000e+00> : vector<64xf32>
    %170 = vector.multi_reduction <add>, %169, %cst_42 [1] : vector<64x128xf32> to vector<64xf32>
    %171 = vector.shape_cast %170 : vector<64xf32> to vector<64x1xf32>
    %172 = math.log %171 : vector<64x1xf32>
    %173 = arith.addf %172, %164 : vector<64x1xf32>
    %174 = vector.broadcast %173 : vector<64x1xf32> to vector<64x128xf32>
    %175 = arith.subf %157, %174 : vector<64x128xf32>
    %c0_43 = arith.constant 0 : index
    %c0_44 = arith.constant 0 : index
    %176 = vector.load %arg10[%c0_43, %c0_44] : memref<64x128xf32, #tpu.memory_space<vmem>>, vector<64x128xf32>
    tpu.vector_store %arg10[%c0_43, %c0_44], %175 {strides = array<i32>} : memref<64x128xf32, #tpu.memory_space<vmem>>, vector<64x128xf32>,
    return
  }
}

</mosaic_0001>

<bundles_post_ra>
// kernel: tpu_custom_call.1
= control target key start
LH: loop header
LB: loop body
LE: loop exit
PB: predicated region body
PF: predicated region fallthrough
CT: control target
= control target key end

     0   :  { %16 = vsyncpa [#allocation5], 0  ;;  %s4207_s0 = inlined_call_operand.vmem [shape: f32[64,32], index: 0, kind: input, shape index: {}]   ;;  %s4208_s1 = inlined_call_operand.vmem [shape: f32[32,32], index: 1, kind: input, shape index: {}]   ;;  %s4209_s2 = inlined_call_operand.vmem [shape: f32[1,32], index: 2, kind: input, shape index: {}]   ;;  %s4210_s3 = inlined_call_operand.vmem [shape: f32[32,128], index: 3, kind: input, shape index: {}]   ;;  %s4211_s4 = inlined_call_operand.vmem [shape: f32[1,128], index: 4, kind: input, shape index: {}]   ;;  %s4212_s5 = inlined_call_operand.vmem [shape: bf16[64,64], index: 5, kind: input, shape index: {}]   ;;  %s4213_s6 = inlined_call_operand.vmem [shape: f32[64,1], index: 6, kind: input, shape index: {}]   ;;  %s4214_s7 = inlined_call_operand.vmem [shape: f32[64,1], index: 7, kind: input, shape index: {}]   ;;  %s4215_s8 = inlined_call_operand.<no memory space> [shape: f32[1], index: 8, kind: input, shape index: {}]   ;;  %s4216_s9 = inlined_call_operand.vmem [shape: f32[11], index: 9, kind: input, shape index: {}]   ;;  %s4217_s10 = inlined_call_operand.hbm [shape: f32[64,128], index: 10, kind: output, shape index: {}]  }
   0x1   :  { %17 = vsyncpa [#allocation4], 0  ;;  %s42_s15 = sshll.u32 %s4216_s9, 4  ;;  %s43_s15 = int_to_ptr.vmem [resolvable:$true] %s42_s15 }
   0x2   :  { %s3308_s16 = scalar_lea.vmem %s43_s15, 16  ;;  %p3313_p1 = scmp.lt.s32.totalorder %s43_s15, %s43_s15 }
   0x3   :  { %p3309_p0 = scmp.ne.s32.totalorder %s43_s15, %s3308_s16  ;;  %p3314_p2 = scmp.lt.s32.totalorder %s3308_s16, %s3308_s16 }
   0x5   :  { %p3315_p3 = por %p3314_p2, %p3313_p1 }
   0x7   :  { %p3316_p4 = pnand %p3315_p3, %p3309_p0 }
   0x9   :  { %3319 = shalt.err (!%p3316_p4)
}
   0xa   :  { %s3346_s17 = smov [#allocation3]  }
   0xb   :  { %45 = dma.vmem_to_smem %s43_s15, 16, %s3346_s17, [#allocation5]  }
   0xc   :  { %3342 = dma.done.wait [#allocation5], 16  }
   0xd   :  { %3343 = vsyncadd [#allocation5], 4294967280 }
   0xe   :  { %49 = sfence }
   0xf   :  { %v59_v0 = vld [vmem:[%s4208_s1] sm:$0xff]  ;;  %v60_v1 = vld [vmem:[%s4208_s1 + $0x8] sm:$0xff]  ;;  %v61_v2 = vld [vmem:[%s4208_s1 + $0x10] sm:$0xff]  ;;  %vm70_vm0 = vcmask 261120   ;;  %v3347_v22 = vmov 0   ;;  %v209_v47 = vstv %s4215_s8  ;;  %vm492_vm9 = vcmask 523264  }
  0x10   :  { %v3165_v3 = vpack.c.bf16 %v60_v1, %v59_v0  ;;  %v62_v4 = vld [vmem:[%s4208_s1 + $0x18] sm:$0xff]  ;;  %v51_v5 = vld [vmem:[%s4207_s0] sm:$0xff]  ;;  %v52_v7 = vld [vmem:[%s4207_s0 + $0x8] sm:$0xff]  ;;  %3266 = vset.pattern.permute.xlu0 %v3347_v22  ;;  %3267 = vset.pattern.permute.xlu1 %v3347_v22  ;;  %s438_s21 = sld [smem:[#allocation3]]  ;;  %s2548_s9 = sld [smem:[#allocation3 + $0x2]] }
  0x11   :  { %v3169_v6 = vpack.c.bf16 %v62_v4, %v61_v2  ;;  %2813 = vmatprep.mubr.msk.f32.mxu0 %vm70_vm0, %v51_v5  ;;  %v53_v8 = vld [vmem:[%s4207_s0 + $0x10] sm:$0xff]  ;;  %v54_v9 = vld [vmem:[%s4207_s0 + $0x18] sm:$0xff]  ;;  %v55_v10 = vld [vmem:[%s4207_s0 + $0x20] sm:$0xff]  ;;  %s2557_s22 = sld [smem:[#allocation3 + $0x3]]  ;;  %s2566_s23 = sld [smem:[#allocation3 + $0x4]] }
  0x12   :  { %3166 = vmatprep.subr.bf16.mxu0 %v3165_v3  ;;  %v56_v11 = vld [vmem:[%s4207_s0 + $0x28] sm:$0xff]  ;;  %v57_v12 = vld [vmem:[%s4207_s0 + $0x30] sm:$0xff]  ;;  %v58_v13 = vld [vmem:[%s4207_s0 + $0x38] sm:$0xff]  ;;  %s2575_s24 = sld [smem:[#allocation3 + $0x5]]  ;;  %s2584_s0 = sld [smem:[#allocation3 + $0x6]] }
  0x13   :  { %3168 = vmatpush3.bf16.msra.mxu0 %v3165_v3  ;;  %v226_v14 = vld [vmem:[%s4210_s3] sm:$0xff]  ;;  %v227_v15 = vld [vmem:[%s4210_s3 + $0x8] sm:$0xff]  ;;  %v228_v17 = vld [vmem:[%s4210_s3 + $0x10] sm:$0xff]  ;;  %s2602_s11 = sld [smem:[#allocation3 + $0x8]]  ;;  %s2611_s12 = sld [smem:[#allocation3 + $0x9]] }
  0x14   :  { %3170 = vmatprep.subr.bf16.mxu0 %v3169_v6  ;;  %v3173_v16 = vpack.c.bf16 %v227_v15, %v226_v14  ;;  %v229_v18 = vld [vmem:[%s4210_s3 + $0x18] sm:$0xff]  ;;  %v374_v20 = vld [vmem:[%s4213_s6] sm:$0xff]  ;;  %v376_v21 = vld [vmem:[%s4213_s6 + $0x10] sm:$0xff]  ;;  %s2620_s13 = sld [smem:[#allocation3 + $0xa]]  ;;  %s3348_s14 = smov [#allocation6]  }
  0x15   :  { %v3177_v19 = vpack.c.bf16 %v229_v18, %v228_v17  ;;  %392 = vperm.xlu0 %3266, %v374_v20   ;;  %402 = vperm.xlu1 %3267, %v376_v21   ;;  %v375_v23 = vld [vmem:[%s4213_s6 + $0x8] sm:$0xff]  ;;  %v377_v24 = vld [vmem:[%s4213_s6 + $0x18] sm:$0xff]  ;;  %v378_v25 = vld [vmem:[%s4213_s6 + $0x20] sm:$0xff]  ;;  %v382_v29 = vmul.f32 %v374_v20, %v374_v20  ;;  %v384_v31 = vmul.f32 %v376_v21, %v376_v21 }
  0x16   :  { %3174 = vmatprep.subr.bf16.mxu1 %v3173_v16  ;;  %v379_v26 = vld [vmem:[%s4213_s6 + $0x28] sm:$0xff]  ;;  %v380_v27 = vld [vmem:[%s4213_s6 + $0x30] sm:$0xff]  ;;  %v381_v28 = vld [vmem:[%s4213_s6 + $0x38] sm:$0xff]  ;;  %v383_v30 = vmul.f32 %v375_v23, %v375_v23  ;;  %v385_v32 = vmul.f32 %v377_v24, %v377_v24  ;;  %v386_v33 = vmul.f32 %v378_v25, %v378_v25  ;;  %s2539_s6 = sld [smem:[#allocation3 + $0x1]] }
  0x17   :  { %3172 = vmatpush3.bf16.msra.mxu0 %v3169_v6  ;;  %3176 = vmatpush3.bf16.msra.mxu1 %v3173_v16  ;;  %v387_v34 = vmul.f32 %v379_v26, %v379_v26  ;;  %v388_v35 = vmul.f32 %v380_v27, %v380_v27  ;;  %v389_v36 = vmul.f32 %v381_v28, %v381_v28  ;;  %v2321_v37 = vld [vmem:[%s4214_s7] sm:$0xff]  ;;  %v2322_v38 = vld [vmem:[%s4214_s7 + $0x8] sm:$0xff]  ;;  %v2323_v39 = vld [vmem:[%s4214_s7 + $0x10] sm:$0xff] }
  0x18   :  { %3178 = vmatprep.subr.bf16.mxu1 %v3177_v19  ;;  %v2324_v40 = vld [vmem:[%s4214_s7 + $0x18] sm:$0xff]  ;;  %v2325_v41 = vld [vmem:[%s4214_s7 + $0x20] sm:$0xff]  ;;  %v2326_v42 = vld [vmem:[%s4214_s7 + $0x28] sm:$0xff] }
  0x19   :  { %397 = vperm.xlu0 %3266, %v375_v23   ;;  %407 = vperm.xlu1 %3267, %v377_v24   ;;  %v2327_v43 = vld [vmem:[%s4214_s7 + $0x30] sm:$0xff]  ;;  %v2328_v44 = vld [vmem:[%s4214_s7 + $0x38] sm:$0xff]  ;;  %v2509_v45 = vld [vmem:[%s4209_s2] ss:$0 sm:$0xff]  ;;  %s2497_s2 = sshll.u32 %s3348_s14, 4  ;;  %s2498_s2 = int_to_ptr.vmem [resolvable:$true] %s2497_s2 }
  0x1a   :  { %2814 = vmatmul.mubr.msk.f32.vlgmr.msra.gmra.mrb[0].mxu0 %vm70_vm0, %v52_v7  ;;  %v3530_v15 = vld [vmem:[%s4212_s5] sm:$0xff]   ;;  %s3320_s7 = scalar_lea.vmem %s2498_s2, 1024  ;;  %p3325_p6 = scmp.lt.s32.totalorder %s2498_s2, %s2498_s2 }
  0x1b   :  { %2816 = vmatprep.mubr.msk.f32.mxu0 %vm70_vm0, %v53_v8  ;;  %3180 = vmatpush3.bf16.msra.mxu1 %v3177_v19  ;;  %v2518_v18 = vld [vmem:[%s4211_s4] ss:$0 sm:$0xff]  ;;  %p3321_p5 = scmp.ne.s32.totalorder %s2498_s2, %s3320_s7  ;;  %p3326_p7 = scmp.lt.s32.totalorder %s3320_s7, %s3320_s7 }
  0x1d   :  { %412 = vperm.xlu0 %3266, %v378_v25   ;;  %417 = vperm.xlu1 %3267, %v379_v26   ;;  %p3327_p8 = por %p3326_p7, %p3325_p6 }
  0x1e   :  { %2817 = vmatmul.mubr.msk.f32.gmra.mrb[2].mxu0 %vm70_vm0, %v54_v9 }
  0x1f   :  { %2819 = vmatprep.mubr.msk.f32.mxu0 %vm70_vm0, %v55_v10  ;;  %p3328_p9 = pnand %p3327_p8, %p3321_p5 }
  0x21   :  { %422 = vperm.xlu0 %3266, %v380_v27   ;;  %427 = vperm.xlu1 %3267, %v381_v28  }
  0x22   :  { %2820 = vmatmul.mubr.msk.f32.gmra.mrb[4].mxu0 %vm70_vm0, %v56_v11 }
  0x23   :  { %2822 = vmatprep.mubr.msk.f32.mxu0 %vm70_vm0, %v57_v12 }
  0x25   :  { %637 = vperm.xlu0 %3266, %v382_v29   ;;  %642 = vperm.xlu1 %3267, %v383_v30  }
  0x26   :  { %2823 = vmatmul.mubr.msk.f32.gmra.mrb[6].mxu0 %vm70_vm0, %v58_v13 }
  0x27   :  { %2853 = vmatprep.mubr.msk.bf16.mxu0 %vm492_vm9, %v3530_v15 }
  0x29   :  { %647 = vperm.xlu0 %3266, %v384_v31   ;;  %652 = vperm.xlu1 %3267, %v385_v32  }
  0x2d   :  { %657 = vperm.xlu0 %3266, %v386_v33   ;;  %662 = vperm.xlu1 %3267, %v387_v34  }
  0x31   :  { %667 = vperm.xlu0 %3266, %v388_v35   ;;  %672 = vperm.xlu1 %3267, %v389_v36  }
  0x35   :  { %2331 = vperm.xlu0 %3266, %v2321_v37   ;;  %2336 = vperm.xlu1 %3267, %v2322_v38  }
  0x39   :  { %2341 = vperm.xlu0 %3266, %v2323_v39   ;;  %2346 = vperm.xlu1 %3267, %v2324_v40  }
  0x3d   :  { %2351 = vperm.xlu0 %3266, %v2325_v41   ;;  %2356 = vperm.xlu1 %3267, %v2326_v42  }
  0x41   :  { %2361 = vperm.xlu0 %3266, %v2327_v43   ;;  %2366 = vperm.xlu1 %3267, %v2328_v44  }
  0x94   :  { %v393_v16 = vpop.permute.xlu0 %392  ;;  %v403_v17 = vpop.permute.xlu1 %402 }
  0x98   :  { %v398_v22 = vpop.permute.xlu0 %397  ;;  %v408_v23 = vpop.permute.xlu1 %407 }
  0x9c   :  { %v418_v33 = vpop.permute.xlu1 %417  ;;  %v413_v38 = vpop.permute.xlu0 %412 }
  0xed   :  { %v2815_v46 = vpop.f32.mrb[0].mxu0 }
  0xee   :  { %v167_v48 = vadd.f32 %v2815_v46, %v2509_v45  ;;  %v161_v49 = vpop.f32.mrb[1].mxu0 }
  0xef   :  { %v162_v50 = vadd.f32 %v2509_v45, %v161_v49 }
  0xf0   :  { %v211_v51 = vmul.f32 %v209_v47, %v167_v48  ;;  %vm202_vm1 = vcmp.ge.f32.partialorder %v167_v48, 0.0 }
  0xf1   :  { %v2818_v52 = vpop.f32.mrb[2].mxu0  ;;  %vm201_vm2 = vcmp.ge.f32.partialorder %v162_v50, 0.0  ;;  %v210_v53 = vmul.f32 %v209_v47, %v162_v50 }
  0xf2   :  { %v177_v54 = vadd.f32 %v2818_v52, %v2509_v45  ;;  %v171_v55 = vpop.f32.mrb[3].mxu0  ;;  %v219_v59 = vsel %vm202_vm1, %v167_v48, %v211_v51 }
  0xf3   :  { %v172_v56 = vadd.f32 %v2509_v45, %v171_v55  ;;  %v218_v57 = vsel %vm201_vm2, %v162_v50, %v210_v53  ;;  %v428_v53 = vpop.permute.xlu1 %427 }
  0xf4   :  { %v213_v58 = vmul.f32 %v209_v47, %v177_v54  ;;  %2833 = vmatprep.mubr.msk.f32.mxu1 %vm70_vm0, %v218_v57  ;;  %vm204_vm3 = vcmp.ge.f32.partialorder %v177_v54, 0.0  ;;  %v423_v57 = vpop.permute.xlu0 %422 }
  0xf5   :  { %vm203_vm4 = vcmp.ge.f32.partialorder %v172_v56, 0.0  ;;  %v212_v60 = vmul.f32 %v209_v47, %v172_v56  ;;  %v2821_v61 = vpop.f32.mrb[4].mxu0  ;;  %2834 = vmatmul.mubr.msk.f32.vlgmr.msra.gmra.mrb[0].mxu1 %vm70_vm0, %v219_v59 }
  0xf6   :  { %v187_v62 = vadd.f32 %v2821_v61, %v2509_v45  ;;  %v181_v63 = vpop.f32.mrb[5].mxu0  ;;  %v221_v3 = vsel %vm204_vm3, %v177_v54, %v213_v58 }
  0xf7   :  { %v182_v0 = vadd.f32 %v2509_v45, %v181_v63  ;;  %v220_v1 = vsel %vm203_vm4, %v172_v56, %v212_v60 }
  0xf8   :  { %v215_v2 = vmul.f32 %v209_v47, %v187_v62  ;;  %2836 = vmatprep.mubr.msk.f32.mxu1 %vm70_vm0, %v220_v1  ;;  %vm206_vm5 = vcmp.ge.f32.partialorder %v187_v62, 0.0 }
  0xf9   :  { %vm205_vm6 = vcmp.ge.f32.partialorder %v182_v0, 0.0  ;;  %v214_v4 = vmul.f32 %v209_v47, %v182_v0  ;;  %v2824_v5 = vpop.f32.mrb[6].mxu0  ;;  %2837 = vmatmul.mubr.msk.f32.gmra.mrb[2].mxu1 %vm70_vm0, %v221_v3 }
  0xfa   :  { %v197_v6 = vadd.f32 %v2824_v5, %v2509_v45  ;;  %v191_v7 = vpop.f32.mrb[7].mxu0  ;;  %v223_v11 = vsel %vm206_vm5, %v187_v62, %v215_v2 }
  0xfb   :  { %v192_v8 = vadd.f32 %v2509_v45, %v191_v7  ;;  %v222_v9 = vsel %vm205_vm6, %v182_v0, %v214_v4 }
  0xfc   :  { %v217_v10 = vmul.f32 %v209_v47, %v197_v6  ;;  %2839 = vmatprep.mubr.msk.f32.mxu1 %vm70_vm0, %v222_v9  ;;  %vm208_vm7 = vcmp.ge.f32.partialorder %v197_v6, 0.0  ;;  %v3574_v9 = vld [vmem:[%s4212_s5 + $0x8] sm:$0xff]  }
  0xfd   :  { %vm207_vm8 = vcmp.ge.f32.partialorder %v192_v8, 0.0  ;;  %v216_v12 = vmul.f32 %v209_v47, %v192_v8  ;;  %2840 = vmatmul.mubr.msk.f32.gmra.mrb[4].mxu1 %vm70_vm0, %v223_v11  ;;  %v3588_v11 = vld [vmem:[%s4212_s5 + $0x18] sm:$0xff]  }
  0xfe   :  { %v225_v14 = vsel %vm208_vm7, %v197_v6, %v217_v10  ;;  %v3579_v10 = vld [vmem:[%s4212_s5 + $0x10] sm:$0xff]  }
  0xff   :  { %v224_v13 = vsel %vm207_vm8, %v192_v8, %v216_v12  ;;  %v3602_v12 = vpop.permute.xlu0 %637 }
 0x100   :  { %2842 = vmatprep.mubr.msk.f32.mxu1 %vm70_vm0, %v224_v13  ;;  %v3604_v13 = vpop.permute.xlu1 %642 }
 0x101   :  { %2843 = vmatmul.mubr.msk.f32.gmra.mrb[6].mxu1 %vm70_vm0, %v225_v14 }
 0x102   :  { %2885 = vmatprep.mubr.msk.bf16.mxu1 %vm492_vm9, %v3530_v15 }
 0x103   :  { %v3606_v14 = vpop.permute.xlu0 %647 }
 0x1c8   :  { %v2835_v19 = vpop.f32.mrb[0].mxu1 }
 0x1c9   :  { %v333_v20 = vadd.f32 %v2835_v19, %v2518_v18  ;;  %v327_v21 = vpop.f32.mrb[1].mxu1  ;;  %v439_v19 = vstv %s438_s21 }
 0x1ca   :  { %v328_v24 = vadd.f32 %v2518_v18, %v327_v21 }
 0x1cb   :  { %v3539_v25 = vmul.f32 %v398_v22, %v333_v20  ;;  %v3611_v22 = vpop.permute.xlu0 %657 }
 0x1cc   :  { %v3541_v26 = vmul.f32 %v393_v16, %v328_v24  ;;  %v2838_v27 = vpop.f32.mrb[2].mxu1  ;;  %v3608_v16 = vpop.permute.xlu1 %652 }
 0x1cd   :  { %v343_v28 = vadd.f32 %v2838_v27, %v2518_v18  ;;  %v337_v29 = vpop.f32.mrb[3].mxu1 }
 0x1ce   :  { %v448_v30 = vpack.c.bf16 %v3539_v25, %v3541_v26  ;;  %v338_v31 = vadd.f32 %v2518_v18, %v337_v29 }
 0x1cf   :  { %v3545_v32 = vmul.f32 %v408_v23, %v343_v28 }
 0x1d0   :  { %v3547_v34 = vmul.f32 %v403_v17, %v338_v31  ;;  %v2841_v35 = vpop.f32.mrb[4].mxu1  ;;  %v452_v36 = vunpack.c.l.bf16 %v448_v30  ;;  %v453_v37 = vunpack.c.h.bf16 %v448_v30  ;;  %v3616_v31 = vpop.permute.xlu1 %662 }
 0x1d1   :  { %v353_v39 = vadd.f32 %v2841_v35, %v2518_v18  ;;  %v347_v40 = vpop.f32.mrb[5].mxu1 }
 0x1d2   :  { %v449_v41 = vpack.c.bf16 %v3545_v32, %v3547_v34  ;;  %v348_v42 = vadd.f32 %v2518_v18, %v347_v40  ;;  %v460_v43 = vsub.f32 %v3541_v26, %v452_v36  ;;  %v461_v45 = vsub.f32 %v3539_v25, %v453_v37 }
 0x1d3   :  { %v3552_v44 = vmul.f32 %v418_v33, %v353_v39  ;;  %v442_v27 = vmul.f32 %v439_v19, %v3547_v34  ;;  %v440_v33 = vmul.f32 %v439_v19, %v3541_v26  ;;  %v443_v37 = vmul.f32 %v439_v19, %v3545_v32 }
 0x1d4   :  { %v3555_v46 = vmul.f32 %v413_v38, %v348_v42  ;;  %v2844_v47 = vpop.f32.mrb[6].mxu1  ;;  %v454_v48 = vunpack.c.l.bf16 %v449_v41  ;;  %v455_v49 = vunpack.c.h.bf16 %v449_v41  ;;  %v468_v52 = vpack.c.bf16 %v461_v45, %v460_v43 }
 0x1d5   :  { %v363_v50 = vadd.f32 %v2844_v47, %v2518_v18  ;;  %v357_v51 = vpop.f32.mrb[7].mxu1 }
 0x1d6   :  { %v450_v54 = vpack.c.bf16 %v3552_v44, %v3555_v46  ;;  %v358_v55 = vadd.f32 %v2518_v18, %v357_v51  ;;  %v462_v56 = vsub.f32 %v3547_v34, %v454_v48  ;;  %2845 = vmatprep.subr.bf16.mxu0 %v468_v52  ;;  %v463_v59 = vsub.f32 %v3545_v32, %v455_v49  ;;  %v3632_v48 = vpop.permute.xlu0 %667 }
 0x1d7   :  { %v3560_v58 = vmul.f32 %v428_v53, %v363_v50  ;;  %2846 = vmatpush3.bf16.msra.mxu0 %v468_v52  ;;  %v684_v18 = vstv %s2539_s6  ;;  %v441_v34 = vmul.f32 %v439_v19, %v3539_v25 }
 0x1d8   :  { %v3563_v60 = vmul.f32 %v423_v57, %v358_v55  ;;  %v456_v61 = vunpack.c.l.bf16 %v450_v54  ;;  %v457_v62 = vunpack.c.h.bf16 %v450_v54  ;;  %v469_v63 = vpack.c.bf16 %v463_v59, %v462_v56  ;;  %v3637_v55 = vpop.permute.xlu1 %672 }
 0x1da   :  { %v451_v0 = vpack.c.bf16 %v3560_v58, %v3563_v60  ;;  %v464_v1 = vsub.f32 %v3555_v46, %v456_v61  ;;  %v465_v2 = vsub.f32 %v3552_v44, %v457_v62  ;;  %2847 = vmatprep.subr.bf16.mxu0 %v469_v63  ;;  %v446_v62 = vmul.f32 %v439_v19, %v3563_v60 }
 0x1db   :  { %2848 = vmatpush3.bf16.msra.mxu0 %v469_v63 }
 0x1dc   :  { %v470_v3 = vpack.c.bf16 %v465_v2, %v464_v1  ;;  %v458_v4 = vunpack.c.l.bf16 %v451_v0  ;;  %v459_v5 = vunpack.c.h.bf16 %v451_v0 }
 0x1de   :  { %2849 = vmatprep.subr.bf16.mxu0 %v470_v3  ;;  %v466_v6 = vsub.f32 %v3563_v60, %v458_v4  ;;  %v467_v7 = vsub.f32 %v3560_v58, %v459_v5 }
 0x1df   :  { %2850 = vmatpush3.bf16.msra.mxu0 %v470_v3  ;;  %v444_v3 = vmul.f32 %v439_v19, %v3555_v46 }
 0x1e0   :  { %v471_v8 = vpack.c.bf16 %v467_v7, %v466_v6  ;;  %v447_v7 = vmul.f32 %v439_v19, %v3560_v58 }
 0x1e2   :  { %2851 = vmatprep.subr.bf16.mxu0 %v471_v8 }
 0x1e3   :  { %2852 = vmatpush3.bf16.msra.mxu0 %v471_v8 }
 0x1e4   :  { %2861 = vmatprep.subr.bf16.mxu0 %v448_v30 }
 0x1e6   :  { %2854 = vmatmul.mubr.msk.bf16.vlgmr.msra.gmra.mrb[8].mxu0 %vm492_vm9, %v3574_v9 }
 0x1e7   :  { %2862 = vmatpush3.bf16.msra.mxu0 %v448_v30  ;;  %2857 = vmatprep.mubr.msk.bf16.mxu0 %vm492_vm9, %v3579_v10 }
 0x1e8   :  { %2863 = vmatprep.subr.bf16.mxu0 %v449_v41 }
 0x1eb   :  { %2864 = vmatpush3.bf16.msra.mxu0 %v449_v41 }
 0x1ec   :  { %2865 = vmatprep.subr.bf16.mxu0 %v450_v54 }
 0x1ee   :  { %2858 = vmatmul.mubr.msk.bf16.gmra.mrb[12].mxu0 %vm492_vm9, %v3588_v11 }
 0x1ef   :  { %2866 = vmatpush3.bf16.msra.mxu0 %v450_v54  ;;  %2869 = vmatprep.mubr.msk.bf16.mxu0 %vm492_vm9, %v3530_v15 }
 0x1f0   :  { %2867 = vmatprep.subr.bf16.mxu0 %v451_v0 }
 0x1f3   :  { %2868 = vmatpush3.bf16.msra.mxu0 %v451_v0 }
 0x1f6   :  { %2870 = vmatmul.mubr.msk.bf16.vlgmr.msra.gmra.mrb[8].mxu0 %vm492_vm9, %v3574_v9 }
 0x1f7   :  { %2873 = vmatprep.mubr.msk.bf16.mxu0 %vm492_vm9, %v3579_v10 }
 0x1fe   :  { %2874 = vmatmul.mubr.msk.bf16.gmra.mrb[12].mxu0 %vm492_vm9, %v3588_v11 }
 0x1ff   :  { %2917 = vmatprep.mubr.msk.bf16.mxu0 %vm492_vm9, %v3530_v15 }
 0x2c9   :  { %v2871_v17 = vpop.f32.mrb[8].mxu0 }
 0x2ca   :  { %v677_v20 = vmul.f32 %v2871_v17, %v3606_v14  ;;  %v604_v21 = vpop.f32.mrb[9].mxu0 }
 0x2cb   :  { %v675_v23 = vmul.f32 %v3602_v12, %v604_v21  ;;  %v2872_v24 = vpop.f32.mrb[10].mxu0  ;;  %v445_v21 = vmul.f32 %v439_v19, %v3552_v44 }
 0x2cc   :  { %v687_v28 = vmul.f32 %v684_v18, %v677_v20  ;;  %v678_v29 = vmul.f32 %v2872_v24, %v3608_v16  ;;  %v607_v30 = vpop.f32.mrb[11].mxu0 }
 0x2cd   :  { %v685_v35 = vmul.f32 %v684_v18, %v675_v23  ;;  %v676_v36 = vmul.f32 %v3604_v13, %v607_v30 }
 0x2ce   :  { %v3621_v38 = vadd.f32 %v687_v28, %v442_v27  ;;  %v688_v39 = vmul.f32 %v684_v18, %v678_v29  ;;  %v3623_v40 = vpack.c.bf16 %v678_v29, %v677_v20 }
 0x2cf   :  { %v3626_v41 = vadd.f32 %v685_v35, %v440_v33  ;;  %v686_v42 = vmul.f32 %v684_v18, %v676_v36  ;;  %v701_v43 = vpack.c.bf16 %v676_v36, %v675_v23 }
 0x2d0   :  { %v3628_v45 = vadd.f32 %v688_v39, %v443_v37  ;;  %v708_v26 = vunpack.c.h.bf16 %v3623_v40  ;;  %v707_v47 = vunpack.c.l.bf16 %v3623_v40  ;;  %v864_v39 = vstv %s2548_s9 }
 0x2d1   :  { %v3634_v32 = vadd.f32 %v686_v42, %v441_v34  ;;  %v706_v49 = vunpack.c.h.bf16 %v701_v43  ;;  %v2875_v50 = vpop.f32.mrb[12].mxu0  ;;  %v705_v51 = vunpack.c.l.bf16 %v701_v43 }
 0x2d2   :  { %v716_v52 = vsub.f32 %v678_v29, %v708_v26  ;;  %v681_v25 = vmul.f32 %v2875_v50, %v3632_v48  ;;  %v620_v53 = vpop.f32.mrb[13].mxu0  ;;  %v715_v54 = vsub.f32 %v677_v20, %v707_v47 }
 0x2d3   :  { %v714_v56 = vsub.f32 %v676_v36, %v706_v49  ;;  %v679_v57 = vmul.f32 %v3611_v22, %v620_v53  ;;  %v2876_v59 = vpop.f32.mrb[14].mxu0  ;;  %v713_v61 = vsub.f32 %v675_v23, %v705_v51 }
 0x2d4   :  { %v691_v63 = vmul.f32 %v684_v18, %v681_v25  ;;  %v682_v0 = vmul.f32 %v2876_v59, %v3637_v55  ;;  %v623_v1 = vpop.f32.mrb[15].mxu0  ;;  %v722_v2 = vpack.c.bf16 %v716_v52, %v715_v54 }
 0x2d5   :  { %v689_v4 = vmul.f32 %v684_v18, %v679_v57  ;;  %v680_v5 = vmul.f32 %v3616_v31, %v623_v1  ;;  %v721_v6 = vpack.c.bf16 %v714_v56, %v713_v61 }
 0x2d6   :  { %v3645_v8 = vadd.f32 %v691_v63, %v446_v62  ;;  %v692_v17 = vmul.f32 %v684_v18, %v682_v0  ;;  %v704_v20 = vpack.c.bf16 %v682_v0, %v681_v25 }
 0x2d7   :  { %v3648_v60 = vadd.f32 %v689_v4, %v444_v3  ;;  %v690_v23 = vmul.f32 %v684_v18, %v680_v5  ;;  %v703_v24 = vpack.c.bf16 %v680_v5, %v679_v57  ;;  %2877 = vmatprep.subr.bf16.mxu1 %v721_v6 }
 0x2d8   :  { %v3650_v27 = vadd.f32 %v692_v17, %v447_v7  ;;  %v712_v46 = vunpack.c.h.bf16 %v704_v20  ;;  %2878 = vmatpush3.bf16.msra.mxu1 %v721_v6  ;;  %v711_v28 = vunpack.c.l.bf16 %v704_v20 }
 0x2d9   :  { %v3652_v29 = vadd.f32 %v690_v23, %v445_v21  ;;  %v710_v30 = vunpack.c.h.bf16 %v703_v24  ;;  %2879 = vmatprep.subr.bf16.mxu1 %v722_v2  ;;  %v709_v58 = vunpack.c.l.bf16 %v703_v24 }
 0x2da   :  { %v720_v33 = vsub.f32 %v682_v0, %v712_v46  ;;  %v719_v35 = vsub.f32 %v681_v25, %v711_v28 }
 0x2db   :  { %v718_v36 = vsub.f32 %v680_v5, %v710_v30  ;;  %v717_v37 = vsub.f32 %v679_v57, %v709_v58 }
 0x2dc   :  { %2880 = vmatpush3.bf16.msra.mxu1 %v722_v2  ;;  %v724_v44 = vpack.c.bf16 %v720_v33, %v719_v35 }
 0x2dd   :  { %v723_v19 = vpack.c.bf16 %v718_v36, %v717_v37 }
 0x2df   :  { %2881 = vmatprep.subr.bf16.mxu1 %v723_v19 }
 0x2e0   :  { %2882 = vmatpush3.bf16.msra.mxu1 %v723_v19 }
 0x2e1   :  { %2883 = vmatprep.subr.bf16.mxu1 %v724_v44 }
 0x2e4   :  { %2884 = vmatpush3.bf16.msra.mxu1 %v724_v44 }
 0x2e5   :  { %2893 = vmatprep.subr.bf16.mxu1 %v701_v43 }
 0x2e7   :  { %2886 = vmatmul.mubr.msk.bf16.vlgmr.msra.gmra.mrb[8].mxu1 %vm492_vm9, %v3574_v9 }
 0x2e8   :  { %2894 = vmatpush3.bf16.msra.mxu1 %v701_v43  ;;  %2889 = vmatprep.mubr.msk.bf16.mxu1 %vm492_vm9, %v3579_v10 }
 0x2e9   :  { %2895 = vmatprep.subr.bf16.mxu1 %v3623_v40 }
 0x2ec   :  { %2896 = vmatpush3.bf16.msra.mxu1 %v3623_v40 }
 0x2ed   :  { %2897 = vmatprep.subr.bf16.mxu1 %v703_v24 }
 0x2ef   :  { %2890 = vmatmul.mubr.msk.bf16.gmra.mrb[12].mxu1 %vm492_vm9, %v3588_v11 }
 0x2f0   :  { %2898 = vmatpush3.bf16.msra.mxu1 %v703_v24  ;;  %2901 = vmatprep.mubr.msk.bf16.mxu1 %vm492_vm9, %v3530_v15 }
 0x2f1   :  { %2899 = vmatprep.subr.bf16.mxu1 %v704_v20 }
 0x2f4   :  { %2900 = vmatpush3.bf16.msra.mxu1 %v704_v20 }
 0x2f7   :  { %2902 = vmatmul.mubr.msk.bf16.vlgmr.msra.gmra.mrb[8].mxu1 %vm492_vm9, %v3574_v9 }
 0x2f8   :  { %2905 = vmatprep.mubr.msk.bf16.mxu1 %vm492_vm9, %v3579_v10 }
 0x2ff   :  { %2906 = vmatmul.mubr.msk.bf16.gmra.mrb[12].mxu1 %vm492_vm9, %v3588_v11 }
 0x300   :  { %2949 = vmatprep.mubr.msk.bf16.mxu1 %vm492_vm9, %v3530_v15 }
 0x3ca   :  { %v2903_v18 = vpop.f32.mrb[8].mxu1 }
 0x3cb   :  { %v857_v40 = vmul.f32 %v2903_v18, %v3606_v14  ;;  %v824_v34 = vpop.f32.mrb[9].mxu1 }
 0x3cc   :  { %v855_v42 = vmul.f32 %v824_v34, %v3602_v12  ;;  %v2904_v43 = vpop.f32.mrb[10].mxu1 }
 0x3cd   :  { %v867_v26 = vmul.f32 %v864_v39, %v857_v40  ;;  %v858_v47 = vmul.f32 %v2904_v43, %v3608_v16  ;;  %v827_v49 = vpop.f32.mrb[11].mxu1 }
 0x3ce   :  { %v865_v50 = vmul.f32 %v864_v39, %v855_v42  ;;  %v856_v51 = vmul.f32 %v827_v49, %v3604_v13 }
 0x3cf   :  { %v3677_v52 = vadd.f32 %v867_v26, %v3621_v38  ;;  %v868_v25 = vmul.f32 %v864_v39, %v858_v47  ;;  %v882_v53 = vpack.c.bf16 %v858_v47, %v857_v40 }
 0x3d0   :  { %v3680_v54 = vadd.f32 %v865_v50, %v3626_v41  ;;  %v866_v56 = vmul.f32 %v864_v39, %v856_v51  ;;  %v881_v57 = vpack.c.bf16 %v856_v51, %v855_v42 }
 0x3d1   :  { %v3683_v59 = vadd.f32 %v868_v25, %v3628_v45  ;;  %v888_v61 = vunpack.c.h.bf16 %v882_v53  ;;  %v887_v62 = vunpack.c.l.bf16 %v882_v53 }
 0x3d2   :  { %v3686_v63 = vadd.f32 %v866_v56, %v3634_v32  ;;  %v886_v0 = vunpack.c.h.bf16 %v881_v57  ;;  %v2907_v1 = vpop.f32.mrb[12].mxu1  ;;  %v885_v2 = vunpack.c.l.bf16 %v881_v57 }
 0x3d3   :  { %v896_v38 = vsub.f32 %v858_v47, %v888_v61  ;;  %v861_v3 = vmul.f32 %v2907_v1, %v3632_v48  ;;  %v840_v4 = vpop.f32.mrb[13].mxu1  ;;  %v895_v5 = vsub.f32 %v857_v40, %v887_v62 }
 0x3d4   :  { %v894_v41 = vsub.f32 %v856_v51, %v886_v0  ;;  %v859_v6 = vmul.f32 %v840_v4, %v3611_v22  ;;  %v2908_v7 = vpop.f32.mrb[14].mxu1  ;;  %v893_v17 = vsub.f32 %v855_v42, %v885_v2 }
 0x3d5   :  { %v871_v45 = vmul.f32 %v864_v39, %v861_v3  ;;  %v862_v20 = vmul.f32 %v2908_v7, %v3637_v55  ;;  %v843_v21 = vpop.f32.mrb[15].mxu1  ;;  %v902_v23 = vpack.c.bf16 %v896_v38, %v895_v5 }
 0x3d6   :  { %v869_v32 = vmul.f32 %v864_v39, %v859_v6  ;;  %v860_v24 = vmul.f32 %v843_v21, %v3616_v31  ;;  %v901_v46 = vpack.c.bf16 %v894_v41, %v893_v17 }
 0x3d7   :  { %v3693_v28 = vadd.f32 %v871_v45, %v3645_v8  ;;  %v872_v30 = vmul.f32 %v864_v39, %v862_v20  ;;  %v884_v58 = vpack.c.bf16 %v862_v20, %v861_v3 }
 0x3d8   :  { %v3696_v33 = vadd.f32 %v869_v32, %v3648_v60  ;;  %v870_v35 = vmul.f32 %v864_v39, %v860_v24  ;;  %v883_v36 = vpack.c.bf16 %v860_v24, %v859_v6  ;;  %2909 = vmatprep.subr.bf16.mxu0 %v901_v46 }
 0x3d9   :  { %v3699_v37 = vadd.f32 %v872_v30, %v3650_v27  ;;  %v892_v44 = vunpack.c.h.bf16 %v884_v58  ;;  %2910 = vmatpush3.bf16.msra.mxu0 %v901_v46  ;;  %v891_v19 = vunpack.c.l.bf16 %v884_v58 }
 0x3da   :  { %v3702_v18 = vadd.f32 %v870_v35, %v3652_v29  ;;  %v890_v40 = vunpack.c.h.bf16 %v883_v36  ;;  %2911 = vmatprep.subr.bf16.mxu0 %v902_v23  ;;  %v889_v8 = vunpack.c.l.bf16 %v883_v36  ;;  %v1044_v29 = vstv %s2557_s22 }
 0x3db   :  { %v900_v34 = vsub.f32 %v862_v20, %v892_v44  ;;  %v899_v42 = vsub.f32 %v861_v3, %v891_v19 }
 0x3dc   :  { %v898_v43 = vsub.f32 %v860_v24, %v890_v40  ;;  %v897_v60 = vsub.f32 %v859_v6, %v889_v8 }
 0x3dd   :  { %2912 = vmatpush3.bf16.msra.mxu0 %v902_v23  ;;  %v904_v39 = vpack.c.bf16 %v900_v34, %v899_v42 }
 0x3de   :  { %v903_v26 = vpack.c.bf16 %v898_v43, %v897_v60 }
 0x3e0   :  { %2913 = vmatprep.subr.bf16.mxu0 %v903_v26 }
 0x3e1   :  { %2914 = vmatpush3.bf16.msra.mxu0 %v903_v26 }
 0x3e2   :  { %2915 = vmatprep.subr.bf16.mxu0 %v904_v39 }
 0x3e5   :  { %2916 = vmatpush3.bf16.msra.mxu0 %v904_v39 }
 0x3e6   :  { %2925 = vmatprep.subr.bf16.mxu0 %v881_v57 }
 0x3e8   :  { %2918 = vmatmul.mubr.msk.bf16.vlgmr.msra.gmra.mrb[16].mxu0 %vm492_vm9, %v3574_v9 }
 0x3e9   :  { %2926 = vmatpush3.bf16.msra.mxu0 %v881_v57  ;;  %2921 = vmatprep.mubr.msk.bf16.mxu0 %vm492_vm9, %v3579_v10 }
 0x3ea   :  { %2927 = vmatprep.subr.bf16.mxu0 %v882_v53 }
 0x3ed   :  { %2928 = vmatpush3.bf16.msra.mxu0 %v882_v53 }
 0x3ee   :  { %2929 = vmatprep.subr.bf16.mxu0 %v883_v36 }
 0x3f0   :  { %2922 = vmatmul.mubr.msk.bf16.gmra.mrb[20].mxu0 %vm492_vm9, %v3588_v11 }
 0x3f1   :  { %2930 = vmatpush3.bf16.msra.mxu0 %v883_v36  ;;  %2933 = vmatprep.mubr.msk.bf16.mxu0 %vm492_vm9, %v3530_v15 }
 0x3f2   :  { %2931 = vmatprep.subr.bf16.mxu0 %v884_v58 }
 0x3f5   :  { %2932 = vmatpush3.bf16.msra.mxu0 %v884_v58 }
 0x3f8   :  { %2934 = vmatmul.mubr.msk.bf16.vlgmr.msra.gmra.mrb[16].mxu0 %vm492_vm9, %v3574_v9 }
 0x3f9   :  { %2937 = vmatprep.mubr.msk.bf16.mxu0 %vm492_vm9, %v3579_v10 }
 0x400   :  { %2938 = vmatmul.mubr.msk.bf16.gmra.mrb[20].mxu0 %vm492_vm9, %v3588_v11 }
 0x401   :  { %2981 = vmatprep.mubr.msk.bf16.mxu0 %vm492_vm9, %v3530_v15 }
 0x4cb   :  { %v2935_v27 = vpop.f32.mrb[16].mxu0 }
 0x4cc   :  { %v1037_v47 = vmul.f32 %v2935_v27, %v3606_v14  ;;  %v1004_v49 = vpop.f32.mrb[17].mxu0 }
 0x4cd   :  { %v1035_v50 = vmul.f32 %v1004_v49, %v3602_v12  ;;  %v2936_v51 = vpop.f32.mrb[18].mxu0 }
 0x4ce   :  { %v1047_v25 = vmul.f32 %v1044_v29, %v1037_v47  ;;  %v1038_v53 = vmul.f32 %v2936_v51, %v3608_v16  ;;  %v1007_v56 = vpop.f32.mrb[19].mxu0 }
 0x4cf   :  { %v1045_v57 = vmul.f32 %v1044_v29, %v1035_v50  ;;  %v1036_v61 = vmul.f32 %v1007_v56, %v3604_v13 }
 0x4d0   :  { %v3725_v62 = vadd.f32 %v1047_v25, %v3677_v52  ;;  %v1048_v0 = vmul.f32 %v1044_v29, %v1038_v53  ;;  %v1062_v1 = vpack.c.bf16 %v1038_v53, %v1037_v47 }
 0x4d1   :  { %v3728_v2 = vadd.f32 %v1045_v57, %v3680_v54  ;;  %v1046_v38 = vmul.f32 %v1044_v29, %v1036_v61  ;;  %v1061_v3 = vpack.c.bf16 %v1036_v61, %v1035_v50 }
 0x4d2   :  { %v3731_v4 = vadd.f32 %v1048_v0, %v3683_v59  ;;  %v1068_v5 = vunpack.c.h.bf16 %v1062_v1  ;;  %v1067_v41 = vunpack.c.l.bf16 %v1062_v1 }
 0x4d3   :  { %v3734_v6 = vadd.f32 %v1046_v38, %v3686_v63  ;;  %v1066_v7 = vunpack.c.h.bf16 %v1061_v3  ;;  %v2939_v17 = vpop.f32.mrb[20].mxu0  ;;  %v1065_v45 = vunpack.c.l.bf16 %v1061_v3 }
 0x4d4   :  { %v1076_v52 = vsub.f32 %v1038_v53, %v1068_v5  ;;  %v1041_v20 = vmul.f32 %v2939_v17, %v3632_v48  ;;  %v1020_v21 = vpop.f32.mrb[21].mxu0  ;;  %v1075_v23 = vsub.f32 %v1037_v47, %v1067_v41 }
 0x4d5   :  { %v1074_v54 = vsub.f32 %v1036_v61, %v1066_v7  ;;  %v1039_v32 = vmul.f32 %v1020_v21, %v3611_v22  ;;  %v2940_v24 = vpop.f32.mrb[22].mxu0  ;;  %v1073_v46 = vsub.f32 %v1035_v50, %v1065_v45 }
 0x4d6   :  { %v1051_v59 = vmul.f32 %v1044_v29, %v1041_v20  ;;  %v1042_v30 = vmul.f32 %v2940_v24, %v3637_v55  ;;  %v1023_v58 = vpop.f32.mrb[23].mxu0  ;;  %v1082_v35 = vpack.c.bf16 %v1076_v52, %v1075_v23 }
 0x4d7   :  { %v1049_v63 = vmul.f32 %v1044_v29, %v1039_v32  ;;  %v1040_v36 = vmul.f32 %v1023_v58, %v3616_v31  ;;  %v1081_v44 = vpack.c.bf16 %v1074_v54, %v1073_v46 }
 0x4d8   :  { %v3741_v19 = vadd.f32 %v1051_v59, %v3693_v28  ;;  %v1052_v40 = vmul.f32 %v1044_v29, %v1042_v30  ;;  %v1064_v8 = vpack.c.bf16 %v1042_v30, %v1041_v20 }
 0x4d9   :  { %v3744_v34 = vadd.f32 %v1049_v63, %v3696_v33  ;;  %v1050_v42 = vmul.f32 %v1044_v29, %v1040_v36  ;;  %v1063_v43 = vpack.c.bf16 %v1040_v36, %v1039_v32  ;;  %2941 = vmatprep.subr.bf16.mxu1 %v1081_v44 }
 0x4da   :  { %v3747_v60 = vadd.f32 %v1052_v40, %v3699_v37  ;;  %v1072_v39 = vunpack.c.h.bf16 %v1064_v8  ;;  %2942 = vmatpush3.bf16.msra.mxu1 %v1081_v44  ;;  %v1071_v26 = vunpack.c.l.bf16 %v1064_v8 }
 0x4db   :  { %v3750_v27 = vadd.f32 %v1050_v42, %v3702_v18  ;;  %v1070_v47 = vunpack.c.h.bf16 %v1063_v43  ;;  %2943 = vmatprep.subr.bf16.mxu1 %v1082_v35  ;;  %v1069_v28 = vunpack.c.l.bf16 %v1063_v43  ;;  %v1224_v18 = vstv %s2566_s23 }
 0x4dc   :  { %v1080_v49 = vsub.f32 %v1042_v30, %v1072_v39  ;;  %v1079_v50 = vsub.f32 %v1041_v20, %v1071_v26 }
 0x4dd   :  { %v1078_v51 = vsub.f32 %v1040_v36, %v1070_v47  ;;  %v1077_v33 = vsub.f32 %v1039_v32, %v1069_v28 }
 0x4de   :  { %2944 = vmatpush3.bf16.msra.mxu1 %v1082_v35  ;;  %v1084_v29 = vpack.c.bf16 %v1080_v49, %v1079_v50 }
 0x4df   :  { %v1083_v25 = vpack.c.bf16 %v1078_v51, %v1077_v33 }
 0x4e1   :  { %2945 = vmatprep.subr.bf16.mxu1 %v1083_v25 }
 0x4e2   :  { %2946 = vmatpush3.bf16.msra.mxu1 %v1083_v25 }
 0x4e3   :  { %2947 = vmatprep.subr.bf16.mxu1 %v1084_v29 }
 0x4e6   :  { %2948 = vmatpush3.bf16.msra.mxu1 %v1084_v29 }
 0x4e7   :  { %2957 = vmatprep.subr.bf16.mxu1 %v1061_v3 }
 0x4e9   :  { %2950 = vmatmul.mubr.msk.bf16.vlgmr.msra.gmra.mrb[16].mxu1 %vm492_vm9, %v3574_v9 }
 0x4ea   :  { %2958 = vmatpush3.bf16.msra.mxu1 %v1061_v3  ;;  %2953 = vmatprep.mubr.msk.bf16.mxu1 %vm492_vm9, %v3579_v10 }
 0x4eb   :  { %2959 = vmatprep.subr.bf16.mxu1 %v1062_v1 }
 0x4ee   :  { %2960 = vmatpush3.bf16.msra.mxu1 %v1062_v1 }
 0x4ef   :  { %2961 = vmatprep.subr.bf16.mxu1 %v1063_v43 }
 0x4f1   :  { %2954 = vmatmul.mubr.msk.bf16.gmra.mrb[20].mxu1 %vm492_vm9, %v3588_v11 }
 0x4f2   :  { %2962 = vmatpush3.bf16.msra.mxu1 %v1063_v43  ;;  %2965 = vmatprep.mubr.msk.bf16.mxu1 %vm492_vm9, %v3530_v15 }
 0x4f3   :  { %2963 = vmatprep.subr.bf16.mxu1 %v1064_v8 }
 0x4f6   :  { %2964 = vmatpush3.bf16.msra.mxu1 %v1064_v8 }
 0x4f9   :  { %2966 = vmatmul.mubr.msk.bf16.vlgmr.msra.gmra.mrb[16].mxu1 %vm492_vm9, %v3574_v9 }
 0x4fa   :  { %2969 = vmatprep.mubr.msk.bf16.mxu1 %vm492_vm9, %v3579_v10 }
 0x501   :  { %2970 = vmatmul.mubr.msk.bf16.gmra.mrb[20].mxu1 %vm492_vm9, %v3588_v11 }
 0x502   :  { %3013 = vmatprep.mubr.msk.bf16.mxu1 %vm492_vm9, %v3530_v15 }
 0x5cc   :  { %v2967_v37 = vpop.f32.mrb[16].mxu1 }
 0x5cd   :  { %v1217_v53 = vmul.f32 %v2967_v37, %v3606_v14  ;;  %v1184_v56 = vpop.f32.mrb[17].mxu1 }
 0x5ce   :  { %v1215_v57 = vmul.f32 %v1184_v56, %v3602_v12  ;;  %v2968_v61 = vpop.f32.mrb[18].mxu1 }
 0x5cf   :  { %v1227_v0 = vmul.f32 %v1224_v18, %v1217_v53  ;;  %v1218_v1 = vmul.f32 %v2968_v61, %v3608_v16  ;;  %v1187_v38 = vpop.f32.mrb[19].mxu1 }
 0x5d0   :  { %v1225_v3 = vmul.f32 %v1224_v18, %v1215_v57  ;;  %v1216_v5 = vmul.f32 %v1187_v38, %v3604_v13 }
 0x5d1   :  { %v3773_v41 = vadd.f32 %v1227_v0, %v3725_v62  ;;  %v1228_v7 = vmul.f32 %v1224_v18, %v1218_v1  ;;  %v1242_v17 = vpack.c.bf16 %v1218_v1, %v1217_v53 }
 0x5d2   :  { %v3776_v45 = vadd.f32 %v1225_v3, %v3728_v2  ;;  %v1226_v52 = vmul.f32 %v1224_v18, %v1216_v5  ;;  %v1241_v20 = vpack.c.bf16 %v1216_v5, %v1215_v57 }
 0x5d3   :  { %v3779_v21 = vadd.f32 %v1228_v7, %v3731_v4  ;;  %v1248_v23 = vunpack.c.h.bf16 %v1242_v17  ;;  %v1247_v54 = vunpack.c.l.bf16 %v1242_v17 }
 0x5d4   :  { %v3782_v32 = vadd.f32 %v1226_v52, %v3734_v6  ;;  %v1246_v24 = vunpack.c.h.bf16 %v1241_v20  ;;  %v2971_v46 = vpop.f32.mrb[20].mxu1  ;;  %v1245_v59 = vunpack.c.l.bf16 %v1241_v20 }
 0x5d5   :  { %v1256_v62 = vsub.f32 %v1218_v1, %v1248_v23  ;;  %v1221_v30 = vmul.f32 %v2971_v46, %v3632_v48  ;;  %v1200_v58 = vpop.f32.mrb[21].mxu1  ;;  %v1255_v35 = vsub.f32 %v1217_v53, %v1247_v54 }
 0x5d6   :  { %v1254_v2 = vsub.f32 %v1216_v5, %v1246_v24  ;;  %v1219_v63 = vmul.f32 %v1200_v58, %v3611_v22  ;;  %v2972_v36 = vpop.f32.mrb[22].mxu1  ;;  %v1253_v44 = vsub.f32 %v1215_v57, %v1245_v59 }
 0x5d7   :  { %v1231_v4 = vmul.f32 %v1224_v18, %v1221_v30  ;;  %v1222_v40 = vmul.f32 %v2972_v36, %v3637_v55  ;;  %v1203_v8 = vpop.f32.mrb[23].mxu1  ;;  %v1262_v42 = vpack.c.bf16 %v1256_v62, %v1255_v35 }
 0x5d8   :  { %v1229_v6 = vmul.f32 %v1224_v18, %v1219_v63  ;;  %v1220_v43 = vmul.f32 %v1203_v8, %v3616_v31  ;;  %v1261_v39 = vpack.c.bf16 %v1254_v2, %v1253_v44 }
 0x5d9   :  { %v3789_v26 = vadd.f32 %v1231_v4, %v3741_v19  ;;  %v1232_v47 = vmul.f32 %v1224_v18, %v1222_v40  ;;  %v1244_v28 = vpack.c.bf16 %v1222_v40, %v1221_v30 }
 0x5da   :  { %v3792_v49 = vadd.f32 %v1229_v6, %v3744_v34  ;;  %v1230_v50 = vmul.f32 %v1224_v18, %v1220_v43  ;;  %v1243_v51 = vpack.c.bf16 %v1220_v43, %v1219_v63  ;;  %2973 = vmatprep.subr.bf16.mxu0 %v1261_v39 }
 0x5db   :  { %v3795_v33 = vadd.f32 %v1232_v47, %v3747_v60  ;;  %v1252_v29 = vunpack.c.h.bf16 %v1244_v28  ;;  %2974 = vmatpush3.bf16.msra.mxu0 %v1261_v39  ;;  %v1251_v25 = vunpack.c.l.bf16 %v1244_v28 }
 0x5dc   :  { %v3798_v37 = vadd.f32 %v1230_v50, %v3750_v27  ;;  %v1250_v53 = vunpack.c.h.bf16 %v1243_v51  ;;  %2975 = vmatprep.subr.bf16.mxu0 %v1262_v42  ;;  %v1249_v19 = vunpack.c.l.bf16 %v1243_v51  ;;  %v1404_v27 = vstv %s2575_s24 }
 0x5dd   :  { %v1260_v56 = vsub.f32 %v1222_v40, %v1252_v29  ;;  %v1259_v57 = vsub.f32 %v1221_v30, %v1251_v25 }
 0x5de   :  { %v1258_v61 = vsub.f32 %v1220_v43, %v1250_v53  ;;  %v1257_v34 = vsub.f32 %v1219_v63, %v1249_v19 }
 0x5df   :  { %2976 = vmatpush3.bf16.msra.mxu0 %v1262_v42  ;;  %v1264_v18 = vpack.c.bf16 %v1260_v56, %v1259_v57 }
 0x5e0   :  { %v1263_v0 = vpack.c.bf16 %v1258_v61, %v1257_v34 }
 0x5e2   :  { %2977 = vmatprep.subr.bf16.mxu0 %v1263_v0 }
 0x5e3   :  { %2978 = vmatpush3.bf16.msra.mxu0 %v1263_v0 }
 0x5e4   :  { %2979 = vmatprep.subr.bf16.mxu0 %v1264_v18 }
 0x5e7   :  { %2980 = vmatpush3.bf16.msra.mxu0 %v1264_v18 }
 0x5e8   :  { %2989 = vmatprep.subr.bf16.mxu0 %v1241_v20 }
 0x5ea   :  { %2982 = vmatmul.mubr.msk.bf16.vlgmr.msra.gmra.mrb[24].mxu0 %vm492_vm9, %v3574_v9 }
 0x5eb   :  { %2990 = vmatpush3.bf16.msra.mxu0 %v1241_v20  ;;  %2985 = vmatprep.mubr.msk.bf16.mxu0 %vm492_vm9, %v3579_v10 }
 0x5ec   :  { %2991 = vmatprep.subr.bf16.mxu0 %v1242_v17 }
 0x5ef   :  { %2992 = vmatpush3.bf16.msra.mxu0 %v1242_v17 }
 0x5f0   :  { %2993 = vmatprep.subr.bf16.mxu0 %v1243_v51 }
 0x5f2   :  { %2986 = vmatmul.mubr.msk.bf16.gmra.mrb[28].mxu0 %vm492_vm9, %v3588_v11 }
 0x5f3   :  { %2994 = vmatpush3.bf16.msra.mxu0 %v1243_v51  ;;  %2997 = vmatprep.mubr.msk.bf16.mxu0 %vm492_vm9, %v3530_v15 }
 0x5f4   :  { %2995 = vmatprep.subr.bf16.mxu0 %v1244_v28 }
 0x5f7   :  { %2996 = vmatpush3.bf16.msra.mxu0 %v1244_v28 }
 0x5fa   :  { %2998 = vmatmul.mubr.msk.bf16.vlgmr.msra.gmra.mrb[24].mxu0 %vm492_vm9, %v3574_v9 }
 0x5fb   :  { %3001 = vmatprep.mubr.msk.bf16.mxu0 %vm492_vm9, %v3579_v10 }
 0x602   :  { %3002 = vmatmul.mubr.msk.bf16.gmra.mrb[28].mxu0 %vm492_vm9, %v3588_v11 }
 0x603   :  { %3045 = vmatprep.mubr.msk.bf16.mxu0 %vm492_vm9, %v3530_v15 }
 0x6cd   :  { %v2999_v60 = vpop.f32.mrb[24].mxu0 }
 0x6ce   :  { %v1397_v1 = vmul.f32 %v2999_v60, %v3606_v14  ;;  %v1364_v38 = vpop.f32.mrb[25].mxu0 }
 0x6cf   :  { %v1395_v3 = vmul.f32 %v1364_v38, %v3602_v12  ;;  %v3000_v5 = vpop.f32.mrb[26].mxu0 }
 0x6d0   :  { %v1407_v7 = vmul.f32 %v1404_v27, %v1397_v1  ;;  %v1398_v17 = vmul.f32 %v3000_v5, %v3608_v16  ;;  %v1367_v52 = vpop.f32.mrb[27].mxu0 }
 0x6d1   :  { %v1405_v20 = vmul.f32 %v1404_v27, %v1395_v3  ;;  %v1396_v23 = vmul.f32 %v1367_v52, %v3604_v13 }
 0x6d2   :  { %v3821_v54 = vadd.f32 %v1407_v7, %v3773_v41  ;;  %v1408_v24 = vmul.f32 %v1404_v27, %v1398_v17  ;;  %v1422_v46 = vpack.c.bf16 %v1398_v17, %v1397_v1 }
 0x6d3   :  { %v3824_v59 = vadd.f32 %v1405_v20, %v3776_v45  ;;  %v1406_v62 = vmul.f32 %v1404_v27, %v1396_v23  ;;  %v1421_v30 = vpack.c.bf16 %v1396_v23, %v1395_v3 }
 0x6d4   :  { %v3827_v58 = vadd.f32 %v1408_v24, %v3779_v21  ;;  %v1428_v35 = vunpack.c.h.bf16 %v1422_v46  ;;  %v1427_v2 = vunpack.c.l.bf16 %v1422_v46 }
 0x6d5   :  { %v3830_v63 = vadd.f32 %v1406_v62, %v3782_v32  ;;  %v1426_v36 = vunpack.c.h.bf16 %v1421_v30  ;;  %v3003_v44 = vpop.f32.mrb[28].mxu0  ;;  %v1425_v4 = vunpack.c.l.bf16 %v1421_v30 }
 0x6d6   :  { %v1436_v41 = vsub.f32 %v1398_v17, %v1428_v35  ;;  %v1401_v40 = vmul.f32 %v3003_v44, %v3632_v48  ;;  %v1380_v8 = vpop.f32.mrb[29].mxu0  ;;  %v1435_v42 = vsub.f32 %v1397_v1, %v1427_v2 }
 0x6d7   :  { %v1434_v45 = vsub.f32 %v1396_v23, %v1426_v36  ;;  %v1399_v6 = vmul.f32 %v1380_v8, %v3611_v22  ;;  %v3004_v43 = vpop.f32.mrb[30].mxu0  ;;  %v1433_v39 = vsub.f32 %v1395_v3, %v1425_v4 }
 0x6d8   :  { %v1411_v21 = vmul.f32 %v1404_v27, %v1401_v40  ;;  %v1402_v47 = vmul.f32 %v3004_v43, %v3637_v55  ;;  %v1383_v28 = vpop.f32.mrb[31].mxu0  ;;  %v1442_v50 = vpack.c.bf16 %v1436_v41, %v1435_v42 }
 0x6d9   :  { %v1409_v32 = vmul.f32 %v1404_v27, %v1399_v6  ;;  %v1400_v51 = vmul.f32 %v1383_v28, %v3616_v31  ;;  %v1441_v29 = vpack.c.bf16 %v1434_v45, %v1433_v39 }
 0x6da   :  { %v3837_v25 = vadd.f32 %v1411_v21, %v3789_v26  ;;  %v1412_v53 = vmul.f32 %v1404_v27, %v1402_v47  ;;  %v1424_v19 = vpack.c.bf16 %v1402_v47, %v1401_v40 }
 0x6db   :  { %v3840_v56 = vadd.f32 %v1409_v32, %v3792_v49  ;;  %v1410_v57 = vmul.f32 %v1404_v27, %v1400_v51  ;;  %v1423_v61 = vpack.c.bf16 %v1400_v51, %v1399_v6  ;;  %3005 = vmatprep.subr.bf16.mxu1 %v1441_v29 }
 0x6dc   :  { %v3843_v34 = vadd.f32 %v1412_v53, %v3795_v33  ;;  %v1432_v18 = vunpack.c.h.bf16 %v1424_v19  ;;  %3006 = vmatpush3.bf16.msra.mxu1 %v1441_v29  ;;  %v1431_v0 = vunpack.c.l.bf16 %v1424_v19  ;;  %v3865_v33 = vld [vmem:[%s4212_s5] sm:$0xff]  }
 0x6dd   :  { %v3846_v60 = vadd.f32 %v1410_v57, %v3798_v37  ;;  %v1430_v1 = vunpack.c.h.bf16 %v1423_v61  ;;  %3007 = vmatprep.subr.bf16.mxu1 %v1442_v50  ;;  %v1429_v26 = vunpack.c.l.bf16 %v1423_v61  ;;  %v1584_v37 = vstv %s2584_s0 }
 0x6de   :  { %v1440_v38 = vsub.f32 %v1402_v47, %v1432_v18  ;;  %v1439_v3 = vsub.f32 %v1401_v40, %v1431_v0 }
 0x6df   :  { %v1438_v5 = vsub.f32 %v1400_v51, %v1430_v1  ;;  %v1437_v49 = vsub.f32 %v1399_v6, %v1429_v26 }
 0x6e0   :  { %3008 = vmatpush3.bf16.msra.mxu1 %v1442_v50  ;;  %v1444_v27 = vpack.c.bf16 %v1440_v38, %v1439_v3 }
 0x6e1   :  { %v1443_v7 = vpack.c.bf16 %v1438_v5, %v1437_v49 }
 0x6e3   :  { %3009 = vmatprep.subr.bf16.mxu1 %v1443_v7 }
 0x6e4   :  { %3010 = vmatpush3.bf16.msra.mxu1 %v1443_v7 }
 0x6e5   :  { %3011 = vmatprep.subr.bf16.mxu1 %v1444_v27 }
 0x6e8   :  { %3012 = vmatpush3.bf16.msra.mxu1 %v1444_v27 }
 0x6e9   :  { %3021 = vmatprep.subr.bf16.mxu1 %v1421_v30 }
 0x6eb   :  { %3014 = vmatmul.mubr.msk.bf16.vlgmr.msra.gmra.mrb[24].mxu1 %vm492_vm9, %v3574_v9 }
 0x6ec   :  { %3022 = vmatpush3.bf16.msra.mxu1 %v1421_v30  ;;  %3017 = vmatprep.mubr.msk.bf16.mxu1 %vm492_vm9, %v3579_v10 }
 0x6ed   :  { %3023 = vmatprep.subr.bf16.mxu1 %v1422_v46 }
 0x6f0   :  { %3024 = vmatpush3.bf16.msra.mxu1 %v1422_v46 }
 0x6f1   :  { %3025 = vmatprep.subr.bf16.mxu1 %v1423_v61 }
 0x6f3   :  { %3018 = vmatmul.mubr.msk.bf16.gmra.mrb[28].mxu1 %vm492_vm9, %v3588_v11 }
 0x6f4   :  { %3026 = vmatpush3.bf16.msra.mxu1 %v1423_v61  ;;  %3029 = vmatprep.mubr.msk.bf16.mxu1 %vm492_vm9, %v3530_v15 }
 0x6f5   :  { %3027 = vmatprep.subr.bf16.mxu1 %v1424_v19 }
 0x6f8   :  { %3028 = vmatpush3.bf16.msra.mxu1 %v1424_v19 }
 0x6fb   :  { %3030 = vmatmul.mubr.msk.bf16.vlgmr.msra.gmra.mrb[24].mxu1 %vm492_vm9, %v3574_v9 }
 0x6fc   :  { %3033 = vmatprep.mubr.msk.bf16.mxu1 %vm492_vm9, %v3579_v10 }
 0x703   :  { %3034 = vmatmul.mubr.msk.bf16.gmra.mrb[28].mxu1 %vm492_vm9, %v3588_v11 }
 0x704   :  { %3077 = vmatprep.mubr.msk.bf16.mxu1 %vm492_vm9, %v3865_v33 }
 0x7ce   :  { %v3031_v15 = vpop.f32.mrb[24].mxu1 }
 0x7cf   :  { %v1577_v17 = vmul.f32 %v3031_v15, %v3606_v14  ;;  %v1544_v9 = vpop.f32.mrb[25].mxu1 }
 0x7d0   :  { %v1575_v52 = vmul.f32 %v1544_v9, %v3602_v12  ;;  %v3032_v10 = vpop.f32.mrb[26].mxu1 }
 0x7d1   :  { %v1587_v20 = vmul.f32 %v1584_v37, %v1577_v17  ;;  %v1578_v11 = vmul.f32 %v3032_v10, %v3608_v16  ;;  %v1547_v23 = vpop.f32.mrb[27].mxu1 }
 0x7d2   :  { %v1585_v24 = vmul.f32 %v1584_v37, %v1575_v52  ;;  %v1576_v46 = vmul.f32 %v1547_v23, %v3604_v13 }
 0x7d3   :  { %v3874_v62 = vadd.f32 %v1587_v20, %v3821_v54  ;;  %v1588_v30 = vmul.f32 %v1584_v37, %v1578_v11  ;;  %v1602_v35 = vpack.c.bf16 %v1578_v11, %v1577_v17 }
 0x7d4   :  { %v3877_v2 = vadd.f32 %v1585_v24, %v3824_v59  ;;  %v1586_v36 = vmul.f32 %v1584_v37, %v1576_v46  ;;  %v1601_v44 = vpack.c.bf16 %v1576_v46, %v1575_v52 }
 0x7d5   :  { %v3880_v4 = vadd.f32 %v1588_v30, %v3827_v58  ;;  %v1608_v41 = vunpack.c.h.bf16 %v1602_v35  ;;  %v1607_v40 = vunpack.c.l.bf16 %v1602_v35 }
 0x7d6   :  { %v3883_v8 = vadd.f32 %v1586_v36, %v3830_v63  ;;  %v1606_v42 = vunpack.c.h.bf16 %v1601_v44  ;;  %v3035_v45 = vpop.f32.mrb[28].mxu1  ;;  %v1605_v6 = vunpack.c.l.bf16 %v1601_v44 }
 0x7d7   :  { %v1616_v54 = vsub.f32 %v1578_v11, %v1608_v41  ;;  %v1581_v43 = vmul.f32 %v3035_v45, %v3632_v48  ;;  %v1560_v39 = vpop.f32.mrb[29].mxu1  ;;  %v1615_v21 = vsub.f32 %v1577_v17, %v1607_v40 }
 0x7d8   :  { %v1614_v59 = vsub.f32 %v1576_v46, %v1606_v42  ;;  %v1579_v47 = vmul.f32 %v1560_v39, %v3611_v22  ;;  %v3036_v28 = vpop.f32.mrb[30].mxu1  ;;  %v1613_v50 = vsub.f32 %v1575_v52, %v1605_v6  ;;  %v3918_v52 = vld [vmem:[%s4212_s5 + $0x18] sm:$0xff]  }
 0x7d9   :  { %v1591_v58 = vmul.f32 %v1584_v37, %v1581_v43  ;;  %v1582_v32 = vmul.f32 %v3036_v28, %v3637_v55  ;;  %v1563_v51 = vpop.f32.mrb[31].mxu1  ;;  %v1622_v29 = vpack.c.bf16 %v1616_v54, %v1615_v21 }
 0x7da   :  { %v1589_v63 = vmul.f32 %v1584_v37, %v1579_v47  ;;  %v1580_v53 = vmul.f32 %v1563_v51, %v3616_v31  ;;  %v1621_v19 = vpack.c.bf16 %v1614_v59, %v1613_v50 }
 0x7db   :  { %v3890_v57 = vadd.f32 %v1591_v58, %v3837_v25  ;;  %v1592_v61 = vmul.f32 %v1584_v37, %v1582_v32  ;;  %v1604_v18 = vpack.c.bf16 %v1582_v32, %v1581_v43 }
 0x7dc   :  { %v3893_v0 = vadd.f32 %v1589_v63, %v3840_v56  ;;  %v1590_v1 = vmul.f32 %v1584_v37, %v1580_v53  ;;  %v1603_v26 = vpack.c.bf16 %v1580_v53, %v1579_v47  ;;  %3037 = vmatprep.subr.bf16.mxu0 %v1621_v19 }
 0x7dd   :  { %v3896_v38 = vadd.f32 %v1592_v61, %v3843_v34  ;;  %v1612_v3 = vunpack.c.h.bf16 %v1604_v18  ;;  %3038 = vmatpush3.bf16.msra.mxu0 %v1621_v19  ;;  %v1611_v5 = vunpack.c.l.bf16 %v1604_v18  ;;  %v3904_v34 = vld [vmem:[%s4212_s5 + $0x8] sm:$0xff]  }
 0x7de   :  { %v3899_v49 = vadd.f32 %v1590_v1, %v3846_v60  ;;  %v1610_v27 = vunpack.c.h.bf16 %v1603_v26  ;;  %3039 = vmatprep.subr.bf16.mxu0 %v1622_v29  ;;  %v1609_v25 = vunpack.c.l.bf16 %v1603_v26  ;;  %v3911_v60 = vld [vmem:[%s4212_s5 + $0x10] sm:$0xff]   ;;  %s2593_s5 = sld [smem:[#allocation3 + $0x7]] }
 0x7df   :  { %v1620_v7 = vsub.f32 %v1582_v32, %v1612_v3  ;;  %v1619_v15 = vsub.f32 %v1581_v43, %v1611_v5 }
 0x7e0   :  { %v1618_v17 = vsub.f32 %v1580_v53, %v1610_v27  ;;  %v1617_v56 = vsub.f32 %v1579_v47, %v1609_v25 }
 0x7e1   :  { %3040 = vmatpush3.bf16.msra.mxu0 %v1622_v29  ;;  %v1624_v37 = vpack.c.bf16 %v1620_v7, %v1619_v15 }
 0x7e2   :  { %v1623_v9 = vpack.c.bf16 %v1618_v17, %v1617_v56 }
 0x7e4   :  { %3041 = vmatprep.subr.bf16.mxu0 %v1623_v9  ;;  %v1764_v20 = vstv %s2593_s5 }
 0x7e5   :  { %3042 = vmatpush3.bf16.msra.mxu0 %v1623_v9 }
 0x7e6   :  { %3043 = vmatprep.subr.bf16.mxu0 %v1624_v37 }
 0x7e9   :  { %3044 = vmatpush3.bf16.msra.mxu0 %v1624_v37 }
 0x7ea   :  { %3053 = vmatprep.subr.bf16.mxu0 %v1601_v44 }
 0x7ec   :  { %3046 = vmatmul.mubr.msk.bf16.vlgmr.msra.gmra.mrb[32].mxu0 %vm492_vm9, %v3904_v34 }
 0x7ed   :  { %3054 = vmatpush3.bf16.msra.mxu0 %v1601_v44  ;;  %3049 = vmatprep.mubr.msk.bf16.mxu0 %vm492_vm9, %v3911_v60 }
 0x7ee   :  { %3055 = vmatprep.subr.bf16.mxu0 %v1602_v35 }
 0x7f1   :  { %3056 = vmatpush3.bf16.msra.mxu0 %v1602_v35 }
 0x7f2   :  { %3057 = vmatprep.subr.bf16.mxu0 %v1603_v26 }
 0x7f4   :  { %3050 = vmatmul.mubr.msk.bf16.gmra.mrb[36].mxu0 %vm492_vm9, %v3918_v52 }
 0x7f5   :  { %3058 = vmatpush3.bf16.msra.mxu0 %v1603_v26  ;;  %3061 = vmatprep.mubr.msk.bf16.mxu0 %vm492_vm9, %v3865_v33 }
 0x7f6   :  { %3059 = vmatprep.subr.bf16.mxu0 %v1604_v18 }
 0x7f9   :  { %3060 = vmatpush3.bf16.msra.mxu0 %v1604_v18 }
 0x7fc   :  { %3062 = vmatmul.mubr.msk.bf16.vlgmr.msra.gmra.mrb[32].mxu0 %vm492_vm9, %v3904_v34 }
 0x7fd   :  { %3065 = vmatprep.mubr.msk.bf16.mxu0 %vm492_vm9, %v3911_v60 }
 0x804   :  { %3066 = vmatmul.mubr.msk.bf16.gmra.mrb[36].mxu0 %vm492_vm9, %v3918_v52 }
 0x805   :  { %3109 = vmatprep.mubr.msk.bf16.mxu0 %vm492_vm9, %v3865_v33 }
 0x8cf   :  { %v3063_v10 = vpop.f32.mrb[32].mxu0 }
 0x8d0   :  { %v1757_v11 = vmul.f32 %v3063_v10, %v3606_v14  ;;  %v1724_v23 = vpop.f32.mrb[33].mxu0 }
 0x8d1   :  { %v1755_v24 = vmul.f32 %v1724_v23, %v3602_v12  ;;  %v3064_v46 = vpop.f32.mrb[34].mxu0 }
 0x8d2   :  { %v1767_v30 = vmul.f32 %v1764_v20, %v1757_v11  ;;  %v1758_v35 = vmul.f32 %v3064_v46, %v3608_v16  ;;  %v1727_v36 = vpop.f32.mrb[35].mxu0 }
 0x8d3   :  { %v1765_v44 = vmul.f32 %v1764_v20, %v1755_v24  ;;  %v1756_v41 = vmul.f32 %v1727_v36, %v3604_v13 }
 0x8d4   :  { %v3937_v40 = vadd.f32 %v1767_v30, %v3874_v62  ;;  %v1768_v42 = vmul.f32 %v1764_v20, %v1758_v35  ;;  %v1782_v45 = vpack.c.bf16 %v1758_v35, %v1757_v11 }
 0x8d5   :  { %v3940_v6 = vadd.f32 %v1765_v44, %v3877_v2  ;;  %v1766_v54 = vmul.f32 %v1764_v20, %v1756_v41  ;;  %v1781_v43 = vpack.c.bf16 %v1756_v41, %v1755_v24 }
 0x8d6   :  { %v3943_v39 = vadd.f32 %v1768_v42, %v3880_v4  ;;  %v1788_v21 = vunpack.c.h.bf16 %v1782_v45  ;;  %v1787_v59 = vunpack.c.l.bf16 %v1782_v45 }
 0x8d7   :  { %v3946_v47 = vadd.f32 %v1766_v54, %v3883_v8  ;;  %v1786_v28 = vunpack.c.h.bf16 %v1781_v43  ;;  %v3067_v50 = vpop.f32.mrb[36].mxu0  ;;  %v1785_v58 = vunpack.c.l.bf16 %v1781_v43 }
 0x8d8   :  { %v1796_v62 = vsub.f32 %v1758_v35, %v1788_v21  ;;  %v1761_v32 = vmul.f32 %v3067_v50, %v3632_v48  ;;  %v1740_v51 = vpop.f32.mrb[37].mxu0  ;;  %v1795_v29 = vsub.f32 %v1757_v11, %v1787_v59 }
 0x8d9   :  { %v1794_v2 = vsub.f32 %v1756_v41, %v1786_v28  ;;  %v1759_v63 = vmul.f32 %v1740_v51, %v3611_v22  ;;  %v3068_v53 = vpop.f32.mrb[38].mxu0  ;;  %v1793_v19 = vsub.f32 %v1755_v24, %v1785_v58 }
 0x8da   :  { %v1771_v4 = vmul.f32 %v1764_v20, %v1761_v32  ;;  %v1762_v61 = vmul.f32 %v3068_v53, %v3637_v55  ;;  %v1743_v18 = vpop.f32.mrb[39].mxu0  ;;  %v1802_v1 = vpack.c.bf16 %v1796_v62, %v1795_v29 }
 0x8db   :  { %v1769_v8 = vmul.f32 %v1764_v20, %v1759_v63  ;;  %v1760_v26 = vmul.f32 %v1743_v18, %v3616_v31  ;;  %v1801_v3 = vpack.c.bf16 %v1794_v2, %v1793_v19 }
 0x8dc   :  { %v3953_v5 = vadd.f32 %v1771_v4, %v3890_v57  ;;  %v1772_v27 = vmul.f32 %v1764_v20, %v1762_v61  ;;  %v1784_v25 = vpack.c.bf16 %v1762_v61, %v1761_v32 }
 0x8dd   :  { %v3956_v7 = vadd.f32 %v1769_v8, %v3893_v0  ;;  %v1770_v15 = vmul.f32 %v1764_v20, %v1760_v26  ;;  %v1783_v17 = vpack.c.bf16 %v1760_v26, %v1759_v63  ;;  %3069 = vmatprep.subr.bf16.mxu1 %v1801_v3 }
 0x8de   :  { %v3959_v56 = vadd.f32 %v1772_v27, %v3896_v38  ;;  %v1792_v37 = vunpack.c.h.bf16 %v1784_v25  ;;  %3070 = vmatpush3.bf16.msra.mxu1 %v1801_v3  ;;  %v1791_v9 = vunpack.c.l.bf16 %v1784_v25 }
 0x8df   :  { %v3962_v10 = vadd.f32 %v1770_v15, %v3899_v49  ;;  %v1790_v11 = vunpack.c.h.bf16 %v1783_v17  ;;  %3071 = vmatprep.subr.bf16.mxu1 %v1802_v1  ;;  %v1789_v57 = vunpack.c.l.bf16 %v1783_v17  ;;  %v1944_v49 = vstv %s2602_s11 }
 0x8e0   :  { %v1800_v23 = vsub.f32 %v1762_v61, %v1792_v37  ;;  %v1799_v24 = vsub.f32 %v1761_v32, %v1791_v9 }
 0x8e1   :  { %v1798_v46 = vsub.f32 %v1760_v26, %v1790_v11  ;;  %v1797_v0 = vsub.f32 %v1759_v63, %v1789_v57 }
 0x8e2   :  { %3072 = vmatpush3.bf16.msra.mxu1 %v1802_v1  ;;  %v1804_v20 = vpack.c.bf16 %v1800_v23, %v1799_v24 }
 0x8e3   :  { %v1803_v30 = vpack.c.bf16 %v1798_v46, %v1797_v0 }
 0x8e5   :  { %3073 = vmatprep.subr.bf16.mxu1 %v1803_v30 }
 0x8e6   :  { %3074 = vmatpush3.bf16.msra.mxu1 %v1803_v30 }
 0x8e7   :  { %3075 = vmatprep.subr.bf16.mxu1 %v1804_v20 }
 0x8ea   :  { %3076 = vmatpush3.bf16.msra.mxu1 %v1804_v20 }
 0x8eb   :  { %3085 = vmatprep.subr.bf16.mxu1 %v1781_v43 }
 0x8ed   :  { %3078 = vmatmul.mubr.msk.bf16.vlgmr.msra.gmra.mrb[32].mxu1 %vm492_vm9, %v3904_v34 }
 0x8ee   :  { %3086 = vmatpush3.bf16.msra.mxu1 %v1781_v43  ;;  %3081 = vmatprep.mubr.msk.bf16.mxu1 %vm492_vm9, %v3911_v60 }
 0x8ef   :  { %3087 = vmatprep.subr.bf16.mxu1 %v1782_v45 }
 0x8f2   :  { %3088 = vmatpush3.bf16.msra.mxu1 %v1782_v45 }
 0x8f3   :  { %3089 = vmatprep.subr.bf16.mxu1 %v1783_v17 }
 0x8f5   :  { %3082 = vmatmul.mubr.msk.bf16.gmra.mrb[36].mxu1 %vm492_vm9, %v3918_v52 }
 0x8f6   :  { %3090 = vmatpush3.bf16.msra.mxu1 %v1783_v17  ;;  %3093 = vmatprep.mubr.msk.bf16.mxu1 %vm492_vm9, %v3865_v33 }
 0x8f7   :  { %3091 = vmatprep.subr.bf16.mxu1 %v1784_v25 }
 0x8fa   :  { %3092 = vmatpush3.bf16.msra.mxu1 %v1784_v25 }
 0x8fd   :  { %3094 = vmatmul.mubr.msk.bf16.vlgmr.msra.gmra.mrb[32].mxu1 %vm492_vm9, %v3904_v34 }
 0x8fe   :  { %3097 = vmatprep.mubr.msk.bf16.mxu1 %vm492_vm9, %v3911_v60 }
 0x905   :  { %3098 = vmatmul.mubr.msk.bf16.gmra.mrb[36].mxu1 %vm492_vm9, %v3918_v52 }
 0x906   :  { %3141 = vmatprep.mubr.msk.bf16.mxu1 %vm492_vm9, %v3865_v33 }
 0x9d0   :  { %v3095_v38 = vpop.f32.mrb[32].mxu1 }
 0x9d1   :  { %v1937_v35 = vmul.f32 %v3095_v38, %v3606_v14  ;;  %v1904_v36 = vpop.f32.mrb[33].mxu1 }
 0x9d2   :  { %v1935_v44 = vmul.f32 %v1904_v36, %v3602_v12  ;;  %v3096_v41 = vpop.f32.mrb[34].mxu1 }
 0x9d3   :  { %v1947_v42 = vmul.f32 %v1944_v49, %v1937_v35  ;;  %v1938_v45 = vmul.f32 %v3096_v41, %v3608_v16  ;;  %v1907_v54 = vpop.f32.mrb[35].mxu1 }
 0x9d4   :  { %v1945_v43 = vmul.f32 %v1944_v49, %v1935_v44  ;;  %v1936_v21 = vmul.f32 %v1907_v54, %v3604_v13 }
 0x9d5   :  { %v3985_v59 = vadd.f32 %v1947_v42, %v3937_v40  ;;  %v1948_v28 = vmul.f32 %v1944_v49, %v1938_v45  ;;  %v1962_v50 = vpack.c.bf16 %v1938_v45, %v1937_v35 }
 0x9d6   :  { %v3988_v58 = vadd.f32 %v1945_v43, %v3940_v6  ;;  %v1946_v62 = vmul.f32 %v1944_v49, %v1936_v21  ;;  %v1961_v32 = vpack.c.bf16 %v1936_v21, %v1935_v44 }
 0x9d7   :  { %v3991_v51 = vadd.f32 %v1948_v28, %v3943_v39  ;;  %v1968_v29 = vunpack.c.h.bf16 %v1962_v50  ;;  %v1967_v2 = vunpack.c.l.bf16 %v1962_v50 }
 0x9d8   :  { %v3994_v63 = vadd.f32 %v1946_v62, %v3946_v47  ;;  %v1966_v53 = vunpack.c.h.bf16 %v1961_v32  ;;  %v3099_v19 = vpop.f32.mrb[36].mxu1  ;;  %v1965_v4 = vunpack.c.l.bf16 %v1961_v32 }
 0x9d9   :  { %v1976_v40 = vsub.f32 %v1938_v45, %v1968_v29  ;;  %v1941_v61 = vmul.f32 %v3099_v19, %v3632_v48  ;;  %v1920_v18 = vpop.f32.mrb[37].mxu1  ;;  %v1975_v1 = vsub.f32 %v1937_v35, %v1967_v2 }
 0x9da   :  { %v1974_v6 = vsub.f32 %v1936_v21, %v1966_v53  ;;  %v1939_v8 = vmul.f32 %v1920_v18, %v3611_v22  ;;  %v3100_v26 = vpop.f32.mrb[38].mxu1  ;;  %v1973_v3 = vsub.f32 %v1935_v44, %v1965_v4 }
 0x9db   :  { %v1951_v39 = vmul.f32 %v1944_v49, %v1941_v61  ;;  %v1942_v27 = vmul.f32 %v3100_v26, %v3637_v55  ;;  %v1923_v25 = vpop.f32.mrb[39].mxu1  ;;  %v1982_v15 = vpack.c.bf16 %v1976_v40, %v1975_v1 }
 0x9dc   :  { %v1949_v47 = vmul.f32 %v1944_v49, %v1939_v8  ;;  %v1940_v17 = vmul.f32 %v1923_v25, %v3616_v31  ;;  %v1981_v37 = vpack.c.bf16 %v1974_v6, %v1973_v3 }
 0x9dd   :  { %v4001_v9 = vadd.f32 %v1951_v39, %v3953_v5  ;;  %v1952_v11 = vmul.f32 %v1944_v49, %v1942_v27  ;;  %v1964_v57 = vpack.c.bf16 %v1942_v27, %v1941_v61 }
 0x9de   :  { %v4004_v23 = vadd.f32 %v1949_v47, %v3956_v7  ;;  %v1950_v24 = vmul.f32 %v1944_v49, %v1940_v17  ;;  %v1963_v46 = vpack.c.bf16 %v1940_v17, %v1939_v8  ;;  %3101 = vmatprep.subr.bf16.mxu0 %v1981_v37 }
 0x9df   :  { %v4007_v0 = vadd.f32 %v1952_v11, %v3959_v56  ;;  %v1972_v20 = vunpack.c.h.bf16 %v1964_v57  ;;  %3102 = vmatpush3.bf16.msra.mxu0 %v1981_v37  ;;  %v1971_v30 = vunpack.c.l.bf16 %v1964_v57 }
 0x9e0   :  { %v4010_v38 = vadd.f32 %v1950_v24, %v3962_v10  ;;  %v1970_v35 = vunpack.c.h.bf16 %v1963_v46  ;;  %3103 = vmatprep.subr.bf16.mxu0 %v1982_v15  ;;  %v1969_v5 = vunpack.c.l.bf16 %v1963_v46  ;;  %v2124_v10 = vstv %s2611_s12 }
 0x9e1   :  { %v1980_v36 = vsub.f32 %v1942_v27, %v1972_v20  ;;  %v1979_v44 = vsub.f32 %v1941_v61, %v1971_v30 }
 0x9e2   :  { %v1978_v41 = vsub.f32 %v1940_v17, %v1970_v35  ;;  %v1977_v7 = vsub.f32 %v1939_v8, %v1969_v5 }
 0x9e3   :  { %3104 = vmatpush3.bf16.msra.mxu0 %v1982_v15  ;;  %v1984_v49 = vpack.c.bf16 %v1980_v36, %v1979_v44 }
 0x9e4   :  { %v1983_v42 = vpack.c.bf16 %v1978_v41, %v1977_v7 }
 0x9e6   :  { %3105 = vmatprep.subr.bf16.mxu0 %v1983_v42 }
 0x9e7   :  { %3106 = vmatpush3.bf16.msra.mxu0 %v1983_v42 }
 0x9e8   :  { %3107 = vmatprep.subr.bf16.mxu0 %v1984_v49 }
 0x9eb   :  { %3108 = vmatpush3.bf16.msra.mxu0 %v1984_v49 }
 0x9ec   :  { %3117 = vmatprep.subr.bf16.mxu0 %v1961_v32 }
 0x9ee   :  { %3110 = vmatmul.mubr.msk.bf16.vlgmr.msra.gmra.mrb[40].mxu0 %vm492_vm9, %v3904_v34 }
 0x9ef   :  { %3118 = vmatpush3.bf16.msra.mxu0 %v1961_v32  ;;  %3113 = vmatprep.mubr.msk.bf16.mxu0 %vm492_vm9, %v3911_v60 }
 0x9f0   :  { %3119 = vmatprep.subr.bf16.mxu0 %v1962_v50 }
 0x9f3   :  { %3120 = vmatpush3.bf16.msra.mxu0 %v1962_v50 }
 0x9f4   :  { %3121 = vmatprep.subr.bf16.mxu0 %v1963_v46 }
 0x9f6   :  { %3114 = vmatmul.mubr.msk.bf16.gmra.mrb[44].mxu0 %vm492_vm9, %v3918_v52 }
 0x9f7   :  { %3122 = vmatpush3.bf16.msra.mxu0 %v1963_v46  ;;  %3125 = vmatprep.mubr.msk.bf16.mxu0 %vm492_vm9, %v3865_v33 }
 0x9f8   :  { %3123 = vmatprep.subr.bf16.mxu0 %v1964_v57 }
 0x9fb   :  { %3124 = vmatpush3.bf16.msra.mxu0 %v1964_v57 }
 0x9fe   :  { %3126 = vmatmul.mubr.msk.bf16.vlgmr.msra.gmra.mrb[40].mxu0 %vm492_vm9, %v3904_v34 }
 0x9ff   :  { %3129 = vmatprep.mubr.msk.bf16.mxu0 %vm492_vm9, %v3911_v60 }
 0xa06   :  { %3130 = vmatmul.mubr.msk.bf16.gmra.mrb[44].mxu0 %vm492_vm9, %v3918_v52 }
 0xad1   :  { %v3127_v56 = vpop.f32.mrb[40].mxu0 }
 0xad2   :  { %v2117_v45 = vmul.f32 %v3127_v56, %v3606_v14  ;;  %v2084_v54 = vpop.f32.mrb[41].mxu0 }
 0xad3   :  { %v2115_v43 = vmul.f32 %v2084_v54, %v3602_v12  ;;  %v3128_v21 = vpop.f32.mrb[42].mxu0 }
 0xad4   :  { %v2127_v28 = vmul.f32 %v2124_v10, %v2117_v45  ;;  %v2118_v50 = vmul.f32 %v3128_v21, %v3608_v16  ;;  %v2087_v62 = vpop.f32.mrb[43].mxu0 }
 0xad5   :  { %v2125_v32 = vmul.f32 %v2124_v10, %v2115_v43  ;;  %v2116_v29 = vmul.f32 %v2087_v62, %v3604_v13  ;;  %v2304_v62 = vstv %s2620_s13 }
 0xad6   :  { %v2128_v2 = vmul.f32 %v2124_v10, %v2118_v50  ;;  %v2142_v53 = vpack.c.bf16 %v2118_v50, %v2117_v45  ;;  %v4031_v19 = vadd.f32 %v2127_v28, %v3985_v59 }
 0xad7   :  { %v2126_v4 = vmul.f32 %v2124_v10, %v2116_v29  ;;  %v2141_v40 = vpack.c.bf16 %v2116_v29, %v2115_v43  ;;  %v4034_v61 = vadd.f32 %v2125_v32, %v3988_v58 }
 0xad8   :  { %v2148_v18 = vunpack.c.h.bf16 %v2142_v53  ;;  %v2147_v1 = vunpack.c.l.bf16 %v2142_v53  ;;  %v4037_v6 = vadd.f32 %v2128_v2, %v3991_v51 }
 0xad9   :  { %v2146_v8 = vunpack.c.h.bf16 %v2141_v40  ;;  %v3131_v26 = vpop.f32.mrb[44].mxu0  ;;  %v2145_v3 = vunpack.c.l.bf16 %v2141_v40  ;;  %v4040_v39 = vadd.f32 %v2126_v4, %v3994_v63 }
 0xada   :  { %v2156_v27 = vsub.f32 %v2118_v50, %v2148_v18  ;;  %v2121_v59 = vmul.f32 %v3131_v26, %v3632_v48  ;;  %v2100_v25 = vpop.f32.mrb[45].mxu0  ;;  %v2155_v15 = vsub.f32 %v2117_v45, %v2147_v1 }
 0xadb   :  { %v2154_v47 = vsub.f32 %v2116_v29, %v2146_v8  ;;  %v2119_v58 = vmul.f32 %v2100_v25, %v3611_v22  ;;  %v3132_v17 = vpop.f32.mrb[46].mxu0  ;;  %v2153_v37 = vsub.f32 %v2115_v43, %v2145_v3 }
 0xadc   :  { %v2131_v11 = vmul.f32 %v2124_v10, %v2121_v59  ;;  %v2122_v51 = vmul.f32 %v3132_v17, %v3637_v55  ;;  %v2103_v57 = vpop.f32.mrb[47].mxu0  ;;  %v2162_v24 = vpack.c.bf16 %v2156_v27, %v2155_v15 }
 0xadd   :  { %v2129_v46 = vmul.f32 %v2124_v10, %v2119_v58  ;;  %v2120_v20 = vmul.f32 %v2103_v57, %v3616_v31  ;;  %v2161_v63 = vpack.c.bf16 %v2154_v47, %v2153_v37 }
 0xade   :  { %v2132_v30 = vmul.f32 %v2124_v10, %v2122_v51  ;;  %v2144_v35 = vpack.c.bf16 %v2122_v51, %v2121_v59  ;;  %v4047_v5 = vadd.f32 %v2131_v11, %v4001_v9 }
 0xadf   :  { %v2130_v36 = vmul.f32 %v2124_v10, %v2120_v20  ;;  %v2143_v44 = vpack.c.bf16 %v2120_v20, %v2119_v58  ;;  %3133 = vmatprep.subr.bf16.mxu1 %v2161_v63  ;;  %v4050_v41 = vadd.f32 %v2129_v46, %v4004_v23 }
 0xae0   :  { %v2152_v7 = vunpack.c.h.bf16 %v2144_v35  ;;  %3134 = vmatpush3.bf16.msra.mxu1 %v2161_v63  ;;  %v2151_v49 = vunpack.c.l.bf16 %v2144_v35  ;;  %v4053_v42 = vadd.f32 %v2132_v30, %v4007_v0  ;;  %v2377_v0 = vlaneseq }
 0xae1   :  { %v2150_v56 = vunpack.c.h.bf16 %v2143_v44  ;;  %3135 = vmatprep.subr.bf16.mxu1 %v2162_v24  ;;  %v2149_v45 = vunpack.c.l.bf16 %v2143_v44  ;;  %v4056_v54 = vadd.f32 %v2130_v36, %v4010_v38  ;;  %v2332_v38 = vpop.permute.xlu0 %2331 }
 0xae2   :  { %v2160_v9 = vsub.f32 %v2122_v51, %v2152_v7  ;;  %v2159_v43 = vsub.f32 %v2121_v59, %v2151_v49  ;;  %v4074_v4 = vand.u32 127, %v2377_v0 }
 0xae3   :  { %v2158_v10 = vsub.f32 %v2120_v20, %v2150_v56  ;;  %v2157_v21 = vsub.f32 %v2119_v58, %v2149_v45 }
 0xae4   :  { %3136 = vmatpush3.bf16.msra.mxu1 %v2162_v24  ;;  %v2164_v28 = vpack.c.bf16 %v2160_v9, %v2159_v43  ;;  %vm2379_vm10 = vcmp.lt.s32.totalorder %v4074_v4, 8 }
 0xae5   :  { %v2163_v23 = vpack.c.bf16 %v2158_v10, %v2157_v21  ;;  %v2342_v1 = vpop.permute.xlu0 %2341 }
 0xae7   :  { %3137 = vmatprep.subr.bf16.mxu1 %v2163_v23 }
 0xae8   :  { %3138 = vmatpush3.bf16.msra.mxu1 %v2163_v23 }
 0xae9   :  { %3139 = vmatprep.subr.bf16.mxu1 %v2164_v28  ;;  %v2352_v17 = vpop.permute.xlu0 %2351 }
 0xaec   :  { %3140 = vmatpush3.bf16.msra.mxu1 %v2164_v28 }
 0xaed   :  { %3149 = vmatprep.subr.bf16.mxu1 %v2141_v40 }
 0xaef   :  { %3142 = vmatmul.mubr.msk.bf16.vlgmr.msra.gmra.mrb[40].mxu1 %vm492_vm9, %v3904_v34 }
 0xaf0   :  { %3150 = vmatpush3.bf16.msra.mxu1 %v2141_v40  ;;  %3145 = vmatprep.mubr.msk.bf16.mxu1 %vm492_vm9, %v3911_v60 }
 0xaf1   :  { %3151 = vmatprep.subr.bf16.mxu1 %v2142_v53 }
 0xaf4   :  { %3152 = vmatpush3.bf16.msra.mxu1 %v2142_v53 }
 0xaf5   :  { %3153 = vmatprep.subr.bf16.mxu1 %v2143_v44 }
 0xaf7   :  { %3146 = vmatmul.mubr.msk.bf16.gmra.mrb[44].mxu1 %vm492_vm9, %v3918_v52 }
 0xaf8   :  { %3154 = vmatpush3.bf16.msra.mxu1 %v2143_v44  ;;  %3157 = vmatprep.mubr.msk.bf16.mxu1 %vm492_vm9, %v3865_v33  ;;  %v2337_v33 = vpop.permute.xlu1 %2336 }
 0xaf9   :  { %3155 = vmatprep.subr.bf16.mxu1 %v2144_v35 }
 0xafc   :  { %3156 = vmatpush3.bf16.msra.mxu1 %v2144_v35  ;;  %v2347_v59 = vpop.permute.xlu1 %2346 }
 0xaff   :  { %3158 = vmatmul.mubr.msk.bf16.vlgmr.msra.gmra.mrb[40].mxu1 %vm492_vm9, %v3904_v34 }
 0xb00   :  { %3161 = vmatprep.mubr.msk.bf16.mxu1 %vm492_vm9, %v3911_v60  ;;  %v2357_v63 = vpop.permute.xlu1 %2356 }
 0xb07   :  { %3162 = vmatmul.mubr.msk.bf16.gmra.mrb[44].mxu1 %vm492_vm9, %v3918_v52 }
 0xbd2   :  { %v3159_v50 = vpop.f32.mrb[40].mxu1 }
 0xbd3   :  { %v2297_v32 = vmul.f32 %v3159_v50, %v3606_v14  ;;  %v2264_v29 = vpop.f32.mrb[41].mxu1 }
 0xbd4   :  { %v2295_v2 = vmul.f32 %v2264_v29, %v3602_v12  ;;  %v3160_v53 = vpop.f32.mrb[42].mxu1 }
 0xbd5   :  { %v2307_v34 = vmul.f32 %v2304_v62, %v2297_v32  ;;  %v2298_v60 = vmul.f32 %v3160_v53, %v3608_v16  ;;  %v2267_v40 = vpop.f32.mrb[43].mxu1 }
 0xbd6   :  { %v2305_v18 = vmul.f32 %v2304_v62, %v2295_v2  ;;  %v2296_v52 = vmul.f32 %v2267_v40, %v3604_v13 }
 0xbd7   :  { %v2315_v8 = vadd.f32 %v2307_v34, %v4031_v19  ;;  %v2308_v26 = vmul.f32 %v2304_v62, %v2298_v60 }
 0xbd8   :  { %v2313_v14 = vadd.f32 %v2305_v18, %v4034_v61  ;;  %v2306_v3 = vmul.f32 %v2304_v62, %v2296_v52 }
 0xbd9   :  { %v2316_v12 = vadd.f32 %v2308_v26, %v4037_v6  ;;  %v4082_v27 = vmul.f32 %v2342_v1, %v2315_v8 }
 0xbda   :  { %v2314_v16 = vadd.f32 %v2306_v3, %v4040_v39  ;;  %v3163_v25 = vpop.f32.mrb[44].mxu1  ;;  %v4089_v47 = vmul.f32 %v2332_v38, %v2313_v14 }
 0xbdb   :  { %v2301_v15 = vmul.f32 %v3163_v25, %v3632_v48  ;;  %v2280_v13 = vpop.f32.mrb[45].mxu1  ;;  %v2382_v19 = vsel %vm2379_vm10, %v4082_v27, -3.4028235e+38  ;;  %v4103_v20 = vmul.f32 %v2347_v59, %v2316_v12 }
 0xbdc   :  { %v2299_v61 = vmul.f32 %v2280_v13, %v3611_v22  ;;  %2392 = vmax.xlane.f32.xlu0 %v2382_v19  ;;  %v3164_v58 = vpop.f32.mrb[46].mxu1  ;;  %v4092_v6 = vmul.f32 %v2337_v33, %v2314_v16  ;;  %v2380_v22 = vsel %vm2379_vm10, %v4089_v47, -3.4028235e+38 }
 0xbdd   :  { %v2311_v37 = vmul.f32 %v2304_v62, %v2301_v15  ;;  %v2302_v39 = vmul.f32 %v3164_v58, %v3637_v55  ;;  %v2283_v11 = vpop.f32.mrb[47].mxu1  ;;  %v2383_v44 = vsel %vm2379_vm10, %v4103_v20, -3.4028235e+38 }
 0xbde   :  { %v2309_v51 = vmul.f32 %v2304_v62, %v2299_v61  ;;  %v2300_v48 = vmul.f32 %v2283_v11, %v3616_v31  ;;  %v2381_v57 = vsel %vm2379_vm10, %v4092_v6, -3.4028235e+38 }
 0xbdf   :  { %v2319_v24 = vadd.f32 %v2311_v37, %v4047_v5  ;;  %v2312_v46 = vmul.f32 %v2304_v62, %v2302_v39  ;;  %2390 = vmax.xlane.f32.xlu1 %v2381_v57  ;;  %v2362_v5 = vpop.permute.xlu0 %2361 }
 0xbe0   :  { %v2317_v55 = vadd.f32 %v2309_v51, %v4050_v41  ;;  %v2310_v30 = vmul.f32 %v2304_v62, %v2300_v48  ;;  %2388 = vmax.xlane.f32.xlu0 %v2380_v22 }
 0xbe1   :  { %v2320_v31 = vadd.f32 %v2312_v46, %v4053_v42  ;;  %v4118_v41 = vmul.f32 %v2362_v5, %v2319_v24  ;;  %v2367_v42 = vpop.permute.xlu1 %2366 }
 0xbe2   :  { %v2318_v35 = vadd.f32 %v2310_v30, %v4056_v54  ;;  %v4108_v36 = vmul.f32 %v2352_v17, %v2317_v55 }
 0xbe3   :  { %v4123_v45 = vmul.f32 %v2367_v42, %v2320_v31  ;;  %v2386_v54 = vsel %vm2379_vm10, %v4118_v41, -3.4028235e+38 }
 0xbe4   :  { %2394 = vmax.xlane.f32.xlu0 %v2383_v44  ;;  %v2384_v7 = vsel %vm2379_vm10, %v4108_v36, -3.4028235e+38  ;;  %v4116_v49 = vmul.f32 %v2357_v63, %v2318_v35 }
 0xbe5   :  { %2396 = vmax.xlane.f32.xlu1 %v2384_v7  ;;  %v2387_v9 = vsel %vm2379_vm10, %v4123_v45, -3.4028235e+38 }
 0xbe6   :  { %v2385_v56 = vsel %vm2379_vm10, %v4116_v49, -3.4028235e+38 }
 0xbe8   :  { %2398 = vmax.xlane.f32.xlu0 %v2385_v56 }
 0xbe9   :  { %2400 = vmax.xlane.f32.xlu1 %v2386_v54 }
 0xbec   :  { %2402 = vmax.xlane.f32.xlu0 %v2387_v9 }
 0xc69   :  { %v4131_v43 = vpop.xlane.xlu0 %2392 }
 0xc6a   :  { %v2406_v10 = vsub.f32 %v4082_v27, %v4131_v43 }
 0xc6c   :  { %v2416_v21 = vmul.f32 1.442695, %v2406_v10  ;;  %v4135_v28 = vpop.xlane.xlu1 %2390 }
 0xc6d   :  { %v4137_v23 = vpop.xlane.xlu0 %2388  ;;  %v2405_v38 = vsub.f32 %v4092_v6, %v4135_v28 }
 0xc6e   :  { %3272 = vpow2.f32 %v2416_v21  ;;  %v2404_v0 = vsub.f32 %v4089_v47, %v4137_v23 }
 0xc6f   :  { %v2414_v2 = vmul.f32 1.442695, %v2405_v38 }
 0xc70   :  { %v2412_v50 = vmul.f32 1.442695, %v2404_v0 }
 0xc71   :  { %v4143_v62 = vpop.xlane.xlu0 %2394 }
 0xc72   :  { %3274 = vpow2.f32 %v2412_v50  ;;  %v2407_v32 = vsub.f32 %v4103_v20, %v4143_v62  ;;  %v4147_v29 = vpop.xlane.xlu1 %2396 }
 0xc73   :  { %v2408_v33 = vsub.f32 %v4108_v36, %v4147_v29 }
 0xc74   :  { %v2418_v53 = vmul.f32 1.442695, %v2407_v32 }
 0xc75   :  { %v2420_v34 = vmul.f32 1.442695, %v2408_v33  ;;  %v4151_v60 = vpop.xlane.xlu0 %2398 }
 0xc76   :  { %3276 = vpow2.f32 %v2418_v53  ;;  %v2409_v40 = vsub.f32 %v4116_v49, %v4151_v60  ;;  %v4155_v18 = vpop.xlane.xlu1 %2400 }
 0xc77   :  { %3278 = vpow2.f32 %v2420_v34  ;;  %v2410_v52 = vsub.f32 %v4118_v41, %v4155_v18 }
 0xc78   :  { %v3273_v1 = vpop.eup %3272  ;;  %3280 = vpow2.f32 %v2414_v2  ;;  %v2422_v8 = vmul.f32 1.442695, %v2409_v40 }
 0xc79   :  { %v2424_v26 = vmul.f32 1.442695, %v2410_v52  ;;  %v4159_v14 = vpop.xlane.xlu0 %2402  ;;  %v2430_v3 = vsel %vm2379_vm10, %v3273_v1, 0.0 }
 0xc7a   :  { %v2411_v12 = vsub.f32 %v4123_v45, %v4159_v14  ;;  %2440 = vadd.xlane.f32.xlu1 %v2430_v3 }
 0xc7b   :  { %3282 = vpow2.f32 %v2424_v26 }
 0xc7c   :  { %v3275_v59 = vpop.eup %3274  ;;  %3284 = vpow2.f32 %v2422_v8  ;;  %v2426_v16 = vmul.f32 1.442695, %v2411_v12 }
 0xc7d   :  { %v2428_v25 = vsel %vm2379_vm10, %v3275_v59, 0.0 }
 0xc7e   :  { %2436 = vadd.xlane.f32.xlu1 %v2428_v25  ;;  %3286 = vpow2.f32 %v2426_v16 }
 0xc80   :  { %v3277_v15 = vpop.eup %3276 }
 0xc81   :  { %v3279_v13 = vpop.eup %3278  ;;  %v2431_v19 = vsel %vm2379_vm10, %v3277_v15, 0.0 }
 0xc82   :  { %v3281_v61 = vpop.eup %3280  ;;  %2442 = vadd.xlane.f32.xlu0 %v2431_v19  ;;  %v2432_v58 = vsel %vm2379_vm10, %v3279_v13, 0.0 }
 0xc83   :  { %2444 = vadd.xlane.f32.xlu1 %v2432_v58  ;;  %v2429_v37 = vsel %vm2379_vm10, %v3281_v61, 0.0 }
 0xc85   :  { %v3283_v17 = vpop.eup %3282 }
 0xc86   :  { %v3285_v39 = vpop.eup %3284  ;;  %2438 = vadd.xlane.f32.xlu0 %v2429_v37  ;;  %v2434_v11 = vsel %vm2379_vm10, %v3283_v17, 0.0 }
 0xc87   :  { %2448 = vadd.xlane.f32.xlu1 %v2434_v11  ;;  %v2433_v51 = vsel %vm2379_vm10, %v3285_v39, 0.0 }
 0xc88   :  { %v3287_v48 = vpop.eup %3286 }
 0xc89   :  { %v2435_v57 = vsel %vm2379_vm10, %v3287_v48, 0.0 }
 0xc8a   :  { %2446 = vadd.xlane.f32.xlu0 %v2433_v51 }
 0xc8e   :  { %2450 = vadd.xlane.f32.xlu0 %v2435_v57 }
 0xd07   :  { %v2441_v24 = vpop.xlane.xlu1 %2440 }
 0xd08   :  { %3288 = vlog2.f32 %v2441_v24 }
 0xd0b   :  { %v2437_v46 = vpop.xlane.xlu1 %2436 }
 0xd0c   :  { %3290 = vlog2.f32 %v2437_v46 }
 0xd0f   :  { %v2443_v22 = vpop.xlane.xlu0 %2442 }
 0xd10   :  { %3292 = vlog2.f32 %v2443_v22  ;;  %v2445_v63 = vpop.xlane.xlu1 %2444 }
 0xd11   :  { %3294 = vlog2.f32 %v2445_v63 }
 0xd12   :  { %v3289_v55 = vpop.eup %3288 }
 0xd13   :  { %v2457_v30 = vmul.f32 0.6931472, %v3289_v55  ;;  %v2439_v31 = vpop.xlane.xlu0 %2438 }
 0xd14   :  { %3296 = vlog2.f32 %v2439_v31  ;;  %v2449_v35 = vpop.xlane.xlu1 %2448 }
 0xd15   :  { %v2470_v5 = vadd.f32 %v2457_v30, %v4131_v43  ;;  %3298 = vlog2.f32 %v2449_v35 }
 0xd16   :  { %v3291_v44 = vpop.eup %3290 }
 0xd17   :  { %v2478_v4 = vsub.f32 %v4082_v27, %v2470_v5  ;;  %v2453_v7 = vmul.f32 0.6931472, %v3291_v44  ;;  %v2447_v42 = vpop.xlane.xlu0 %2446 }
 0xd18   :  { %3300 = vlog2.f32 %v2447_v42 }
 0xd19   :  { %2486 = vst [vmem:[#allocation6 + $0x10] sm:$0xff] %v2478_v4  ;;  %v2468_v56 = vadd.f32 %v2453_v7, %v4137_v23 }
 0xd1a   :  { %v3293_v54 = vpop.eup %3292 }
 0xd1b   :  { %v3295_v9 = vpop.eup %3294  ;;  %v2476_v10 = vsub.f32 %v4089_v47, %v2468_v56  ;;  %v2459_v21 = vmul.f32 0.6931472, %v3293_v54  ;;  %v2451_v0 = vpop.xlane.xlu0 %2450 }
 0xd1c   :  { %v2461_v38 = vmul.f32 0.6931472, %v3295_v9  ;;  %3302 = vlog2.f32 %v2451_v0 }
 0xd1d   :  { %2484 = vst [vmem:[#allocation6] sm:$0xff] %v2476_v10  ;;  %v2471_v43 = vadd.f32 %v2459_v21, %v4143_v62 }
 0xd1e   :  { %v3297_v50 = vpop.eup %3296  ;;  %v2472_v27 = vadd.f32 %v2461_v38, %v4147_v29 }
 0xd1f   :  { %v3299_v32 = vpop.eup %3298  ;;  %v2479_v33 = vsub.f32 %v4103_v20, %v2471_v43  ;;  %v2455_v2 = vmul.f32 0.6931472, %v3297_v50 }
 0xd20   :  { %v2480_v23 = vsub.f32 %v4108_v36, %v2472_v27  ;;  %v2465_v53 = vmul.f32 0.6931472, %v3299_v32 }
 0xd21   :  { %2487 = vst [vmem:[#allocation6 + $0x18] sm:$0xff] %v2479_v33  ;;  %v2469_v47 = vadd.f32 %v2455_v2, %v4135_v28 }
 0xd22   :  { %v3301_v34 = vpop.eup %3300  ;;  %2488 = vst [vmem:[#allocation6 + $0x20] sm:$0xff] %v2480_v23  ;;  %v2474_v40 = vadd.f32 %v2465_v53, %v4155_v18 }
 0xd23   :  { %v2477_v52 = vsub.f32 %v4092_v6, %v2469_v47  ;;  %v2463_v62 = vmul.f32 0.6931472, %v3301_v34 }
 0xd24   :  { %v2482_v1 = vsub.f32 %v4118_v41, %v2474_v40 }
 0xd25   :  { %2485 = vst [vmem:[#allocation6 + $0x8] sm:$0xff] %v2477_v52  ;;  %v2473_v29 = vadd.f32 %v2463_v62, %v4151_v60 }
 0xd26   :  { %v3303_v20 = vpop.eup %3302  ;;  %2490 = vst [vmem:[#allocation6 + $0x30] sm:$0xff] %v2482_v1 }
 0xd27   :  { %v2481_v36 = vsub.f32 %v4116_v49, %v2473_v29  ;;  %v2467_v8 = vmul.f32 0.6931472, %v3303_v20 }
 0xd29   :  { %2489 = vst [vmem:[#allocation6 + $0x28] sm:$0xff] %v2481_v36  ;;  %v2475_v28 = vadd.f32 %v2467_v8, %v4159_v14 }
 0xd2b   :  { %v2483_v18 = vsub.f32 %v4123_v45, %v2475_v28 }
 0xd2d   :  { %2491 = vst [vmem:[#allocation6 + $0x38] sm:$0xff] %v2483_v18 }
 0xd2e   :  { %3331 = shalt.err (!%p3328_p9)
}
 0xd2f   :  { %s3332_s4 = scalar_lea.hbm %s4217_s10, 1024 }
 0xd30   :  { %p3333_p10 = scmp.ne.s32.totalorder %s4217_s10, %s3332_s4  ;;  %p3336_p11 = scmp.lt.u32.totalorder %s3332_s4, %s4217_s10 }
 0xd32   :  { %p3338_p12 = pnand %p3336_p11, %p3333_p10 }
 0xd34   :  { %3341 = shalt.err (!%p3338_p12)
}
 0xd35   :  { %s3349_s20 = smov 128   ;;  %s3350_s6 = smov 8  }
 0xd36   :  { %2503 = dma.vmem_to_hbm [thread:$0]  %s2498_s2, 1024, %s4217_s10, [#allocation4], %s3349_s20, %s3349_s20, %s3350_s6  }
 0xd37   :  { %3344 = dma.done.wait [#allocation4], 1024  }
 0xd38   :  { %3345 = vsyncadd [#allocation4], 4294966272 }
 0xd39   :  { %2507 = vsyncpa [#allocation4], 1 }
 0xd3a   :  { %2508 = vsyncpa [#allocation5], 1 }

</bundles_post_ra>
